<compile_context>
chip_gen: v7x
topology: tpu7x:2x2x1
jax: 0.10.0
libtpu: 0.0.40
codegen_flags: <defaults>
</compile_context>

<pallas_src>
import functools
import math

import jax
import jax.numpy as jnp
import numpy as np
from jax.experimental import pallas as pl
from jax.experimental.pallas import tpu as pltpu


_P_PAD = 128  # lane-dense padded width used only for the in-register head matmul


def _activation(name):
    return {
        "tanh": jnp.tanh,
        "sigmoid": jax.nn.sigmoid,
        "relu": lambda v: jnp.maximum(v, 0.0),
        "gelu": jax.nn.gelu,
    }[name]


def imask_kernel(
    x_ref,        # (Bt, S, D)
    a_ref,        # (Bt, S, S)   pre-fused mask ratio  m1/(m0+m1)
    w_ref,        # (L, D, D)
    b_ref,        # (L, D)
    lw_ref,       # (D, H)       linear_layer weight (in, out)
    lb_ref,       # (1, H)
    pw_ref,       # (H, P_PAD)   hidden2p weight, zero-padded beyond col 2
    pb_ref,       # (1, P_PAD)   hidden2p bias, zero-padded beyond col 2
    xprime_ref,   # (Bt, S, D)   output x'
    p_ref,        # (Bt, S, 2)   output p (only the 2 real logits are stored)
    *,
    num_layers,
    non_linearity,
):
    gcn_act = _activation(non_linearity)

    x = x_ref[...].astype(jnp.float32)        # (Bt, S, D)
    a = a_ref[...].astype(jnp.float32)        # (Bt, S, S)
    Bt, S, D = x.shape

    # a * (1 - I) + I  ==  force diagonal to 1 (2-D eye broadcast over Bt)
    rr = jax.lax.broadcasted_iota(jnp.int32, (S, S), 0)
    cc = jax.lax.broadcasted_iota(jnp.int32, (S, S), 1)
    a = jnp.where((rr == cc)[None, :, :], 1.0, a)

    # symmetric degree normalization, applied once: A_norm = D^-1/2 A D^-1/2
    dinv_col = jax.lax.rsqrt(jnp.sum(a, axis=-1, keepdims=True))       # (Bt,S,1)
    dinv_row = jax.lax.rsqrt(jnp.sum(a, axis=-1))[:, None, :]          # (Bt,1,S)
    a = (a * dinv_col) * dinv_row

    # A_norm @ h:  VPU formulation for tiny S (Bt independent SxS matmuls would
    # badly under-fill the MXU); einsum/MXU for production-sized S.
    if S <= 16:
        def spmm(h):
            acc = a[:, :, 0:1] * h[:, 0:1, :]
            for j in range(1, S):
                acc = acc + a[:, :, j:j + 1] * h[:, j:j + 1, :]
            return acc
    else:
        def spmm(h):
            return jnp.einsum("bij,bjd->bid", a, h,
                              preferred_element_type=jnp.float32)

    # GCN layers:  H <- act(A_norm @ H @ W[l] + b[l])
    h = x
    for layer in range(num_layers):
        hh = spmm(h)                                             # (Bt, S, D)
        hw = jnp.dot(hh.reshape(Bt * S, D), w_ref[layer],
                     preferred_element_type=jnp.float32)         # (Bt*S, D)
        hw = hw + b_ref[layer : layer + 1, :]                    # + (1, D)
        h = gcn_act(hw).reshape(Bt, S, D)
        # TODO(synk): F.dropout(p=imask_dropout) skipped -- eval mode (identity).

    # forward_sent_batch on the interaction embeddings (flattened rows)
    hf = h.reshape(Bt * S, D)
    temps = jnp.tanh(
        jnp.dot(hf, lw_ref[...], preferred_element_type=jnp.float32) + lb_ref[...]
    )                                                            # (Bt*S, H)
    p_full = jnp.dot(temps, pw_ref[...],
                     preferred_element_type=jnp.float32) + pb_ref[...]  # (Bt*S, P_PAD)

    # r = softmax(p[:, :2], -1)[:, 1] == sigmoid(p1 - p0)
    r = jax.nn.sigmoid(p_full[:, 1:2] - p_full[:, 0:1])          # (Bt*S, 1)

    xprime = r * (x.reshape(Bt * S, D) + hf)                     # (Bt*S, D)
    xprime_ref[...] = xprime.reshape(Bt, S, D).astype(xprime_ref.dtype)
    p_ref[...] = p_full[:, :2].reshape(Bt, S, 2).astype(p_ref.dtype)


def _vmem_budget():
    """(physical per-core VMEM, cap for vmem_limit_bytes) per TPU generation."""
    try:
        total = int(pltpu.get_tpu_info().vmem_capacity_bytes)
    except Exception:
        total = 128 << 20
    if total <= (64 << 20):            # v7x: 64 MiB / TensorCore -> leave headroom
        return total, 48 << 20
    return total, 96 << 20             # v5e / v6e: 128 MiB physical


def _step_bytes(bt, S, D, H, L, itemsize=4):
    """Rough VMEM working set for one grid step at batch-block bt."""
    # double-buffered streamed blocks: x, a, x', p
    stream = 2 * itemsize * bt * S * (S + 2 * D + 2)
    # parameter blocks (count 2x to be safe if single-buffering is unavailable)
    params = 2 * itemsize * (L * D * D + L * D + D * H + H + H * _P_PAD + _P_PAD)
    # in-kernel f32 temporaries (a copy, h, hh, x copy, temps, p_full)
    temps = 4 * bt * S * (2 * S + 3 * D + H + _P_PAD)
    return stream + params + temps


def _choose_block_batch(B, S, D, H, L, vmem_cap, vmem_total):
    """Largest batch block Bt such that:
       - Bt divides B,
       - the grid keeps >= 4 steps when B >= 4 (>= 2 per v7x core), else >= 2,
       - Bt*S is around the per-generation MXU/row granularity target,
       - the working set stays well inside the VMEM cap."""
    target_rows = 256 if vmem_total >= (100 << 20) else 128
    target_bt = max(1, pl.cdiv(target_rows, S))
    if B >= 4:
        cap = max(1, B // 4)
    elif B > 1:
        cap = max(1, B // 2)
    else:
        cap = 1
    budget = int(vmem_cap * 0.75)      # headroom below the compiler limit
    best = 1
    for bt in range(1, B + 1):
        if B % bt:
            continue
        if bt > min(target_bt, cap):
            break
        if _step_bytes(bt, S, D, H, L) > budget:
            break
        best = bt
    return best


def imask_forward(x, local_mask, W, bias, lin_w, lin_b, p_w, p_b,
                  *, non_linearity="relu", block_batch=None):
    """Eval-mode IMASK forward.  Returns (x_prime, p)."""
    B, S, D = x.shape
    L = W.shape[0]
    H = lin_w.shape[1]
    assert local_mask.shape == (B, S, S, 2)

    # glue (fused by XLA with the channel slice): 2-class softmax of logs is the
    # exact ratio m1/(m0+m1).  Valid for the strictly positive masks that
    # torch.log in the reference requires anyway.
    m0 = local_mask[..., 0].astype(jnp.float32)
    m1 = local_mask[..., 1].astype(jnp.float32)
    a_pre = m1 / (m0 + m1)                                       # (B, S, S)

    # glue: lane-dense head matmul -- zero-pad the 2-wide projection to 128
    # columns (compute only; just 2 columns are ever stored by the kernel).
    pw_pad = jnp.zeros((H, _P_PAD), jnp.float32).at[:, :2].set(p_w.astype(jnp.float32))
    pb_pad = jnp.zeros((1, _P_PAD), jnp.float32).at[:, :2].set(
        jnp.reshape(p_b, (1, 2)).astype(jnp.float32))
    lb = jnp.reshape(lin_b, (1, H))

    vmem_total, vmem_cap = _vmem_budget()
    Bt = block_batch or _choose_block_batch(B, S, D, H, L, vmem_cap, vmem_total)
    assert B % Bt == 0
    grid = (B // Bt,)

    kernel = functools.partial(
        imask_kernel, num_layers=L, non_linearity=non_linearity
    )

    out_shapes = (
        jax.ShapeDtypeStruct((B, S, D), x.dtype),        # x_prime
        jax.ShapeDtypeStruct((B, S, 2), x.dtype),        # p (2 real logits)
    )

    vmem_limit = int(min(max(_step_bytes(Bt, S, D, H, L) + (8 << 20), 16 << 20),
                         vmem_cap))

    def build(single_buffer_params):
        # Constant-index parameter inputs never change across the grid; drop
        # their second pipeline buffer to free VMEM for larger batch tiles.
        pkw = {"pipeline_mode": pl.Buffered(1)} if single_buffer_params else {}
        in_specs = [
            pl.BlockSpec((Bt, S, D), lambda b: (b, 0, 0)),            # x
            pl.BlockSpec((Bt, S, S), lambda b: (b, 0, 0)),            # a_pre
            pl.BlockSpec((L, D, D), lambda b: (0, 0, 0), **pkw),      # W
            pl.BlockSpec((L, D), lambda b: (0, 0), **pkw),            # bias
            pl.BlockSpec((D, H), lambda b: (0, 0), **pkw),            # linear_layer W
            pl.BlockSpec((1, H), lambda b: (0, 0), **pkw),            # linear_layer b
            pl.BlockSpec((H, _P_PAD), lambda b: (0, 0), **pkw),       # hidden2p W (padded)
            pl.BlockSpec((1, _P_PAD), lambda b: (0, 0), **pkw),       # hidden2p b (padded)
        ]
        out_specs = (
            pl.BlockSpec((Bt, S, D), lambda b: (b, 0, 0)),
            pl.BlockSpec((Bt, S, 2), lambda b: (b, 0, 0)),
        )
        return pl.pallas_call(
            kernel,
            out_shape=out_shapes,
            grid=grid,
            in_specs=in_specs,
            out_specs=out_specs,
            compiler_params=pltpu.CompilerParams(
                dimension_semantics=("parallel",),
                vmem_limit_bytes=vmem_limit,
            ),
        )

    args = (x, a_pre, W, bias, lin_w, lb, pw_pad, pb_pad)
    try:
        x_prime, p = build(True)(*args)
    except Exception:
        # TODO(synk): pipeline_mode=pl.Buffered(1) unsupported on this jax build;
        # fall back to default double-buffered constant params.
        x_prime, p = build(False)(*args)
    return x_prime, p


def imask_forward_ref(x, local_mask, W, bias, lin_w, lin_b, p_w, p_b,
                      *, non_linearity="relu"):
    """Pure-JAX reference of the same eval path (original log/softmax form)."""
    act = _activation(non_linearity)
    B, S, D = x.shape
    a = jax.nn.softmax(jnp.log(local_mask), axis=-1)[..., 1]       # (B,S,S)
    eye = jnp.eye(S, dtype=a.dtype)[None]
    a = a * (1.0 - eye) + eye
    d = jnp.sum(a, axis=-1) ** -0.5                                # (B,S)
    a = d[:, :, None] * a * d[:, None, :]
    h = x
    for layer in range(W.shape[0]):
        h = jnp.einsum("bij,bjd->bid", a, h)
        h = jnp.einsum("bid,de->bie", h, W[layer]) + bias[layer][None, None]
        h = act(h)
    temps = jnp.tanh(h @ lin_w + jnp.reshape(lin_b, (1, 1, -1)))
    p = temps @ p_w + jnp.reshape(p_b, (1, 1, -1))
    r = jax.nn.softmax(p, axis=-1)[..., 1]
    x_prime = r[..., None] * (x + h)
    return x_prime, p


if __name__ == "__main__":
    # Small shapes consistent with the module:
    B, S, D, H, L = 2, 8, 32, 16, 2   # batch, seq, embed_dim, mask_hidden_dim, imask_layers

    key = jax.random.PRNGKey(0)
    k = jax.random.split(key, 8)

    # Parameter init mirroring IMASK.reset_parameters (uniform +- 1/sqrt(fan_in))
    stdv_w = 1.0 / math.sqrt(D)
    W = jax.random.uniform(k[0], (L, D, D), jnp.float32, -stdv_w, stdv_w)
    bias = jax.random.uniform(k[1], (L, D), jnp.float32, -stdv_w, stdv_w)
    lin_w = jax.random.uniform(k[2], (D, H), jnp.float32, -stdv_w, stdv_w)
    lin_b = jax.random.uniform(k[3], (1, H), jnp.float32, -stdv_w, stdv_w)
    stdv_p = 1.0 / math.sqrt(H)
    p_w = jax.random.uniform(k[4], (H, 2), jnp.float32, -stdv_p, stdv_p)
    p_b = jax.random.uniform(k[5], (1, 2), jnp.float32, -stdv_p, stdv_p)

    # Inputs (strictly positive mask, as torch.log in the reference requires)
    x = jax.random.normal(k[6], (B, S, D), jnp.float32)
    local_mask = jax.random.uniform(k[7], (B, S, S, 2), jnp.float32,
                                    minval=0.1, maxval=1.0)

    x_prime, p = imask_forward(x, local_mask, W, bias, lin_w, lin_b, p_w, p_b,
                               non_linearity="relu")
    jax.block_until_ready((x_prime, p))

    # sanity check against a pure-JAX reference (original log/softmax form)
    xp_ref, p_ref_ = imask_forward_ref(x, local_mask, W, bias, lin_w, lin_b,
                                       p_w, p_b, non_linearity="relu")
    np.testing.assert_allclose(np.asarray(x_prime), np.asarray(xp_ref),
                               rtol=1e-5, atol=1e-5)
    np.testing.assert_allclose(np.asarray(p), np.asarray(p_ref_),
                               rtol=1e-5, atol=1e-5)

    print("KERNEL_OK")
</pallas_src>

<mosaic_0001>
module attributes {stable_mosaic.version = 11 : i64} {
  func.func @imask_kernel(%arg0: i32, %arg1: memref<1x8x32xf32, #tpu.memory_space<vmem>>, %arg2: memref<1x8x8xf32, #tpu.memory_space<vmem>>, %arg3: memref<2x32x32xf32, #tpu.memory_space<vmem>>, %arg4: memref<2x32xf32, #tpu.memory_space<vmem>>, %arg5: memref<32x16xf32, #tpu.memory_space<vmem>>, %arg6: memref<1x16xf32, #tpu.memory_space<vmem>>, %arg7: memref<16x128xf32, #tpu.memory_space<vmem>>, %arg8: memref<1x128xf32, #tpu.memory_space<vmem>>, %arg9: memref<1x8x32xf32, #tpu.memory_space<vmem>>, %arg10: memref<1x8x2xf32, #tpu.memory_space<vmem>>) attributes {dimension_semantics = [#tpu.dimension_semantics<parallel>], iteration_bounds = array<i64: 2>, scalar_prefetch = 0 : i64, scratch_operands = 0 : i64, tpu.core_type = #tpu.core_type<tc>, window_params = [{transform_indices = @transform_0, window_bounds = array<i64: 1, 8, 32>}, {transform_indices = @transform_1, window_bounds = array<i64: 1, 8, 8>}, {pipeline_mode = #tpu.pipeline_mode<synchronous>, transform_indices = @transform_2, window_bounds = array<i64: 2, 32, 32>}, {pipeline_mode = #tpu.pipeline_mode<synchronous>, transform_indices = @transform_3, window_bounds = array<i64: 2, 32>}, {pipeline_mode = #tpu.pipeline_mode<synchronous>, transform_indices = @transform_4, window_bounds = array<i64: 32, 16>}, {pipeline_mode = #tpu.pipeline_mode<synchronous>, transform_indices = @transform_5, window_bounds = array<i64: 1, 16>}, {pipeline_mode = #tpu.pipeline_mode<synchronous>, transform_indices = @transform_6, window_bounds = array<i64: 16, 128>}, {pipeline_mode = #tpu.pipeline_mode<synchronous>, transform_indices = @transform_7, window_bounds = array<i64: 1, 128>}, {transform_indices = @transform_8, window_bounds = array<i64: 1, 8, 32>}, {transform_indices = @transform_9, window_bounds = array<i64: 1, 8, 2>}]} {
    %c0 = arith.constant 0 : index
    %c0_0 = arith.constant 0 : index
    %c0_1 = arith.constant 0 : index
    %0 = vector.load %arg1[%c0, %c0_0, %c0_1] : memref<1x8x32xf32, #tpu.memory_space<vmem>>, vector<1x8x32xf32>
    %c0_2 = arith.constant 0 : index
    %c0_3 = arith.constant 0 : index
    %c0_4 = arith.constant 0 : index
    %1 = vector.load %arg2[%c0_2, %c0_3, %c0_4] : memref<1x8x8xf32, #tpu.memory_space<vmem>>, vector<1x8x8xf32>
    %2 = tpu.iota {dimensions = array<i32: 0>} : vector<8x8xi32>
    %3 = tpu.iota {dimensions = array<i32: 1>} : vector<8x8xi32>
    %4 = arith.cmpi eq, %2, %3 : vector<8x8xi32>
    %5 = vector.shape_cast %4 : vector<8x8xi1> to vector<1x8x8xi1>
    %cst = arith.constant 1.000000e+00 : f32
    %6 = vector.broadcast %cst : f32 to vector<1x8x8xf32>
    %7 = arith.select %5, %6, %1 : vector<1x8x8xi1>, vector<1x8x8xf32>
    %cst_5 = arith.constant dense<0.000000e+00> : vector<1x8xf32>
    %8 = vector.multi_reduction <add>, %7, %cst_5 [2] : vector<1x8x8xf32> to vector<1x8xf32>
    %9 = vector.shape_cast %8 : vector<1x8xf32> to vector<1x8x1xf32>
    %10 = math.rsqrt %9 : vector<1x8x1xf32>
    %cst_6 = arith.constant dense<0.000000e+00> : vector<1x8xf32>
    %11 = vector.multi_reduction <add>, %7, %cst_6 [2] : vector<1x8x8xf32> to vector<1x8xf32>
    %12 = math.rsqrt %11 : vector<1x8xf32>
    %13 = vector.shape_cast %12 : vector<1x8xf32> to vector<1x1x8xf32>
    %14 = vector.broadcast %10 : vector<1x8x1xf32> to vector<1x8x8xf32>
    %15 = arith.mulf %7, %14 : vector<1x8x8xf32>
    %16 = vector.broadcast %13 : vector<1x1x8xf32> to vector<1x8x8xf32>
    %17 = arith.mulf %15, %16 : vector<1x8x8xf32>
    %18 = vector.extract_strided_slice %17 {offsets = [0, 0, 0], sizes = [1, 8, 1], strides = [1, 1, 1]} : vector<1x8x8xf32> to vector<1x8x1xf32>
    %19 = vector.extract_strided_slice %0 {offsets = [0, 0, 0], sizes = [1, 1, 32], strides = [1, 1, 1]} : vector<1x8x32xf32> to vector<1x1x32xf32>
    %20 = vector.broadcast %18 : vector<1x8x1xf32> to vector<1x8x32xf32>
    %21 = vector.broadcast %19 : vector<1x1x32xf32> to vector<1x8x32xf32>
    %22 = arith.mulf %20, %21 : vector<1x8x32xf32>
    %23 = vector.extract_strided_slice %17 {offsets = [0, 0, 1], sizes = [1, 8, 1], strides = [1, 1, 1]} : vector<1x8x8xf32> to vector<1x8x1xf32>
    %24 = vector.extract_strided_slice %0 {offsets = [0, 1, 0], sizes = [1, 1, 32], strides = [1, 1, 1]} : vector<1x8x32xf32> to vector<1x1x32xf32>
    %25 = vector.broadcast %23 : vector<1x8x1xf32> to vector<1x8x32xf32>
    %26 = vector.broadcast %24 : vector<1x1x32xf32> to vector<1x8x32xf32>
    %27 = arith.mulf %25, %26 : vector<1x8x32xf32>
    %28 = arith.addf %22, %27 : vector<1x8x32xf32>
    %29 = vector.extract_strided_slice %17 {offsets = [0, 0, 2], sizes = [1, 8, 1], strides = [1, 1, 1]} : vector<1x8x8xf32> to vector<1x8x1xf32>
    %30 = vector.extract_strided_slice %0 {offsets = [0, 2, 0], sizes = [1, 1, 32], strides = [1, 1, 1]} : vector<1x8x32xf32> to vector<1x1x32xf32>
    %31 = vector.broadcast %29 : vector<1x8x1xf32> to vector<1x8x32xf32>
    %32 = vector.broadcast %30 : vector<1x1x32xf32> to vector<1x8x32xf32>
    %33 = arith.mulf %31, %32 : vector<1x8x32xf32>
    %34 = arith.addf %28, %33 : vector<1x8x32xf32>
    %35 = vector.extract_strided_slice %17 {offsets = [0, 0, 3], sizes = [1, 8, 1], strides = [1, 1, 1]} : vector<1x8x8xf32> to vector<1x8x1xf32>
    %36 = vector.extract_strided_slice %0 {offsets = [0, 3, 0], sizes = [1, 1, 32], strides = [1, 1, 1]} : vector<1x8x32xf32> to vector<1x1x32xf32>
    %37 = vector.broadcast %35 : vector<1x8x1xf32> to vector<1x8x32xf32>
    %38 = vector.broadcast %36 : vector<1x1x32xf32> to vector<1x8x32xf32>
    %39 = arith.mulf %37, %38 : vector<1x8x32xf32>
    %40 = arith.addf %34, %39 : vector<1x8x32xf32>
    %41 = vector.extract_strided_slice %17 {offsets = [0, 0, 4], sizes = [1, 8, 1], strides = [1, 1, 1]} : vector<1x8x8xf32> to vector<1x8x1xf32>
    %42 = vector.extract_strided_slice %0 {offsets = [0, 4, 0], sizes = [1, 1, 32], strides = [1, 1, 1]} : vector<1x8x32xf32> to vector<1x1x32xf32>
    %43 = vector.broadcast %41 : vector<1x8x1xf32> to vector<1x8x32xf32>
    %44 = vector.broadcast %42 : vector<1x1x32xf32> to vector<1x8x32xf32>
    %45 = arith.mulf %43, %44 : vector<1x8x32xf32>
    %46 = arith.addf %40, %45 : vector<1x8x32xf32>
    %47 = vector.extract_strided_slice %17 {offsets = [0, 0, 5], sizes = [1, 8, 1], strides = [1, 1, 1]} : vector<1x8x8xf32> to vector<1x8x1xf32>
    %48 = vector.extract_strided_slice %0 {offsets = [0, 5, 0], sizes = [1, 1, 32], strides = [1, 1, 1]} : vector<1x8x32xf32> to vector<1x1x32xf32>
    %49 = vector.broadcast %47 : vector<1x8x1xf32> to vector<1x8x32xf32>
    %50 = vector.broadcast %48 : vector<1x1x32xf32> to vector<1x8x32xf32>
    %51 = arith.mulf %49, %50 : vector<1x8x32xf32>
    %52 = arith.addf %46, %51 : vector<1x8x32xf32>
    %53 = vector.extract_strided_slice %17 {offsets = [0, 0, 6], sizes = [1, 8, 1], strides = [1, 1, 1]} : vector<1x8x8xf32> to vector<1x8x1xf32>
    %54 = vector.extract_strided_slice %0 {offsets = [0, 6, 0], sizes = [1, 1, 32], strides = [1, 1, 1]} : vector<1x8x32xf32> to vector<1x1x32xf32>
    %55 = vector.broadcast %53 : vector<1x8x1xf32> to vector<1x8x32xf32>
    %56 = vector.broadcast %54 : vector<1x1x32xf32> to vector<1x8x32xf32>
    %57 = arith.mulf %55, %56 : vector<1x8x32xf32>
    %58 = arith.addf %52, %57 : vector<1x8x32xf32>
    %59 = vector.extract_strided_slice %17 {offsets = [0, 0, 7], sizes = [1, 8, 1], strides = [1, 1, 1]} : vector<1x8x8xf32> to vector<1x8x1xf32>
    %60 = vector.extract_strided_slice %0 {offsets = [0, 7, 0], sizes = [1, 1, 32], strides = [1, 1, 1]} : vector<1x8x32xf32> to vector<1x1x32xf32>
    %61 = vector.broadcast %59 : vector<1x8x1xf32> to vector<1x8x32xf32>
    %62 = vector.broadcast %60 : vector<1x1x32xf32> to vector<1x8x32xf32>
    %63 = arith.mulf %61, %62 : vector<1x8x32xf32>
    %64 = arith.addf %58, %63 : vector<1x8x32xf32>
    %65 = vector.shape_cast %64 : vector<1x8x32xf32> to vector<8x32xf32>
    %c0_7 = arith.constant 0 : index
    %c0_8 = arith.constant 0 : index
    %c0_9 = arith.constant 0 : index
    %66 = vector.load %arg3[%c0_7, %c0_8, %c0_9] : memref<2x32x32xf32, #tpu.memory_space<vmem>>, vector<1x32x32xf32>
    %67 = vector.shape_cast %66 : vector<1x32x32xf32> to vector<32x32xf32>
    %cst_10 = arith.constant dense<0.000000e+00> : vector<8x32xf32>
    %68 = tpu.matmul %65, %67, %cst_10 {dimension_numbers = #tpu.dot_dimension_numbers<[1], [0], [0], [1], [0, 0, 1, 1], [], []>} : vector<8x32xf32>, vector<32x32xf32>, vector<8x32xf32> -> vector<8x32xf32>
    %c0_11 = arith.constant 0 : index
    %c0_12 = arith.constant 0 : index
    %69 = vector.load %arg4[%c0_11, %c0_12] : memref<2x32xf32, #tpu.memory_space<vmem>>, vector<1x32xf32>
    %70 = vector.broadcast %69 : vector<1x32xf32> to vector<8x32xf32>
    %71 = arith.addf %68, %70 : vector<8x32xf32>
    %cst_13 = arith.constant 0.000000e+00 : f32
    %72 = vector.broadcast %cst_13 : f32 to vector<8x32xf32>
    %73 = arith.maximumf %71, %72 : vector<8x32xf32>
    %74 = vector.shape_cast %73 : vector<8x32xf32> to vector<1x8x32xf32>
    %75 = vector.extract_strided_slice %17 {offsets = [0, 0, 0], sizes = [1, 8, 1], strides = [1, 1, 1]} : vector<1x8x8xf32> to vector<1x8x1xf32>
    %76 = vector.extract_strided_slice %74 {offsets = [0, 0, 0], sizes = [1, 1, 32], strides = [1, 1, 1]} : vector<1x8x32xf32> to vector<1x1x32xf32>
    %77 = vector.broadcast %75 : vector<1x8x1xf32> to vector<1x8x32xf32>
    %78 = vector.broadcast %76 : vector<1x1x32xf32> to vector<1x8x32xf32>
    %79 = arith.mulf %77, %78 : vector<1x8x32xf32>
    %80 = vector.extract_strided_slice %17 {offsets = [0, 0, 1], sizes = [1, 8, 1], strides = [1, 1, 1]} : vector<1x8x8xf32> to vector<1x8x1xf32>
    %81 = vector.extract_strided_slice %74 {offsets = [0, 1, 0], sizes = [1, 1, 32], strides = [1, 1, 1]} : vector<1x8x32xf32> to vector<1x1x32xf32>
    %82 = vector.broadcast %80 : vector<1x8x1xf32> to vector<1x8x32xf32>
    %83 = vector.broadcast %81 : vector<1x1x32xf32> to vector<1x8x32xf32>
    %84 = arith.mulf %82, %83 : vector<1x8x32xf32>
    %85 = arith.addf %79, %84 : vector<1x8x32xf32>
    %86 = vector.extract_strided_slice %17 {offsets = [0, 0, 2], sizes = [1, 8, 1], strides = [1, 1, 1]} : vector<1x8x8xf32> to vector<1x8x1xf32>
    %87 = vector.extract_strided_slice %74 {offsets = [0, 2, 0], sizes = [1, 1, 32], strides = [1, 1, 1]} : vector<1x8x32xf32> to vector<1x1x32xf32>
    %88 = vector.broadcast %86 : vector<1x8x1xf32> to vector<1x8x32xf32>
    %89 = vector.broadcast %87 : vector<1x1x32xf32> to vector<1x8x32xf32>
    %90 = arith.mulf %88, %89 : vector<1x8x32xf32>
    %91 = arith.addf %85, %90 : vector<1x8x32xf32>
    %92 = vector.extract_strided_slice %17 {offsets = [0, 0, 3], sizes = [1, 8, 1], strides = [1, 1, 1]} : vector<1x8x8xf32> to vector<1x8x1xf32>
    %93 = vector.extract_strided_slice %74 {offsets = [0, 3, 0], sizes = [1, 1, 32], strides = [1, 1, 1]} : vector<1x8x32xf32> to vector<1x1x32xf32>
    %94 = vector.broadcast %92 : vector<1x8x1xf32> to vector<1x8x32xf32>
    %95 = vector.broadcast %93 : vector<1x1x32xf32> to vector<1x8x32xf32>
    %96 = arith.mulf %94, %95 : vector<1x8x32xf32>
    %97 = arith.addf %91, %96 : vector<1x8x32xf32>
    %98 = vector.extract_strided_slice %17 {offsets = [0, 0, 4], sizes = [1, 8, 1], strides = [1, 1, 1]} : vector<1x8x8xf32> to vector<1x8x1xf32>
    %99 = vector.extract_strided_slice %74 {offsets = [0, 4, 0], sizes = [1, 1, 32], strides = [1, 1, 1]} : vector<1x8x32xf32> to vector<1x1x32xf32>
    %100 = vector.broadcast %98 : vector<1x8x1xf32> to vector<1x8x32xf32>
    %101 = vector.broadcast %99 : vector<1x1x32xf32> to vector<1x8x32xf32>
    %102 = arith.mulf %100, %101 : vector<1x8x32xf32>
    %103 = arith.addf %97, %102 : vector<1x8x32xf32>
    %104 = vector.extract_strided_slice %17 {offsets = [0, 0, 5], sizes = [1, 8, 1], strides = [1, 1, 1]} : vector<1x8x8xf32> to vector<1x8x1xf32>
    %105 = vector.extract_strided_slice %74 {offsets = [0, 5, 0], sizes = [1, 1, 32], strides = [1, 1, 1]} : vector<1x8x32xf32> to vector<1x1x32xf32>
    %106 = vector.broadcast %104 : vector<1x8x1xf32> to vector<1x8x32xf32>
    %107 = vector.broadcast %105 : vector<1x1x32xf32> to vector<1x8x32xf32>
    %108 = arith.mulf %106, %107 : vector<1x8x32xf32>
    %109 = arith.addf %103, %108 : vector<1x8x32xf32>
    %110 = vector.extract_strided_slice %17 {offsets = [0, 0, 6], sizes = [1, 8, 1], strides = [1, 1, 1]} : vector<1x8x8xf32> to vector<1x8x1xf32>
    %111 = vector.extract_strided_slice %74 {offsets = [0, 6, 0], sizes = [1, 1, 32], strides = [1, 1, 1]} : vector<1x8x32xf32> to vector<1x1x32xf32>
    %112 = vector.broadcast %110 : vector<1x8x1xf32> to vector<1x8x32xf32>
    %113 = vector.broadcast %111 : vector<1x1x32xf32> to vector<1x8x32xf32>
    %114 = arith.mulf %112, %113 : vector<1x8x32xf32>
    %115 = arith.addf %109, %114 : vector<1x8x32xf32>
    %116 = vector.extract_strided_slice %17 {offsets = [0, 0, 7], sizes = [1, 8, 1], strides = [1, 1, 1]} : vector<1x8x8xf32> to vector<1x8x1xf32>
    %117 = vector.extract_strided_slice %74 {offsets = [0, 7, 0], sizes = [1, 1, 32], strides = [1, 1, 1]} : vector<1x8x32xf32> to vector<1x1x32xf32>
    %118 = vector.broadcast %116 : vector<1x8x1xf32> to vector<1x8x32xf32>
    %119 = vector.broadcast %117 : vector<1x1x32xf32> to vector<1x8x32xf32>
    %120 = arith.mulf %118, %119 : vector<1x8x32xf32>
    %121 = arith.addf %115, %120 : vector<1x8x32xf32>
    %122 = vector.shape_cast %121 : vector<1x8x32xf32> to vector<8x32xf32>
    %c1 = arith.constant 1 : index
    %c0_14 = arith.constant 0 : index
    %c0_15 = arith.constant 0 : index
    %123 = vector.load %arg3[%c1, %c0_14, %c0_15] : memref<2x32x32xf32, #tpu.memory_space<vmem>>, vector<1x32x32xf32>
    %124 = vector.shape_cast %123 : vector<1x32x32xf32> to vector<32x32xf32>
    %cst_16 = arith.constant dense<0.000000e+00> : vector<8x32xf32>
    %125 = tpu.matmul %122, %124, %cst_16 {dimension_numbers = #tpu.dot_dimension_numbers<[1], [0], [0], [1], [0, 0, 1, 1], [], []>} : vector<8x32xf32>, vector<32x32xf32>, vector<8x32xf32> -> vector<8x32xf32>
    %c1_17 = arith.constant 1 : index
    %c0_18 = arith.constant 0 : index
    %126 = vector.load %arg4[%c1_17, %c0_18] : memref<2x32xf32, #tpu.memory_space<vmem>>, vector<1x32xf32>
    %127 = vector.broadcast %126 : vector<1x32xf32> to vector<8x32xf32>
    %128 = arith.addf %125, %127 : vector<8x32xf32>
    %cst_19 = arith.constant 0.000000e+00 : f32
    %129 = vector.broadcast %cst_19 : f32 to vector<8x32xf32>
    %130 = arith.maximumf %128, %129 : vector<8x32xf32>
    %131 = vector.shape_cast %130 : vector<8x32xf32> to vector<1x8x32xf32>
    %132 = vector.shape_cast %131 : vector<1x8x32xf32> to vector<8x32xf32>
    %c0_20 = arith.constant 0 : index
    %c0_21 = arith.constant 0 : index
    %133 = vector.load %arg5[%c0_20, %c0_21] : memref<32x16xf32, #tpu.memory_space<vmem>>, vector<32x16xf32>
    %cst_22 = arith.constant dense<0.000000e+00> : vector<8x16xf32>
    %134 = tpu.matmul %132, %133, %cst_22 {dimension_numbers = #tpu.dot_dimension_numbers<[1], [0], [0], [1], [0, 0, 1, 1], [], []>} : vector<8x32xf32>, vector<32x16xf32>, vector<8x16xf32> -> vector<8x16xf32>
    %c0_23 = arith.constant 0 : index
    %c0_24 = arith.constant 0 : index
    %135 = vector.load %arg6[%c0_23, %c0_24] : memref<1x16xf32, #tpu.memory_space<vmem>>, vector<1x16xf32>
    %136 = vector.broadcast %135 : vector<1x16xf32> to vector<8x16xf32>
    %137 = arith.addf %134, %136 : vector<8x16xf32>
    %138 = math.tanh %137 : vector<8x16xf32>
    %c0_25 = arith.constant 0 : index
    %c0_26 = arith.constant 0 : index
    %139 = vector.load %arg7[%c0_25, %c0_26] : memref<16x128xf32, #tpu.memory_space<vmem>>, vector<16x128xf32>
    %cst_27 = arith.constant dense<0.000000e+00> : vector<8x128xf32>
    %140 = tpu.matmul %138, %139, %cst_27 {dimension_numbers = #tpu.dot_dimension_numbers<[1], [0], [0], [1], [0, 0, 1, 1], [], []>} : vector<8x16xf32>, vector<16x128xf32>, vector<8x128xf32> -> vector<8x128xf32>
    %c0_28 = arith.constant 0 : index
    %c0_29 = arith.constant 0 : index
    %141 = vector.load %arg8[%c0_28, %c0_29] : memref<1x128xf32, #tpu.memory_space<vmem>>, vector<1x128xf32>
    %142 = vector.broadcast %141 : vector<1x128xf32> to vector<8x128xf32>
    %143 = arith.addf %140, %142 : vector<8x128xf32>
    %144 = vector.extract_strided_slice %143 {offsets = [0, 1], sizes = [8, 1], strides = [1, 1]} : vector<8x128xf32> to vector<8x1xf32>
    %145 = vector.extract_strided_slice %143 {offsets = [0, 0], sizes = [8, 1], strides = [1, 1]} : vector<8x128xf32> to vector<8x1xf32>
    %146 = arith.subf %144, %145 : vector<8x1xf32>
    %147 = arith.negf %146 : vector<8x1xf32>
    %148 = math.exp %147 : vector<8x1xf32>
    %cst_30 = arith.constant 1.000000e+00 : f32
    %149 = vector.broadcast %cst_30 : f32 to vector<8x1xf32>
    %150 = arith.addf %149, %148 : vector<8x1xf32>
    %151 = arith.divf %149, %150 : vector<8x1xf32>
    %152 = vector.shape_cast %0 : vector<1x8x32xf32> to vector<8x32xf32>
    %153 = arith.addf %152, %132 : vector<8x32xf32>
    %154 = vector.broadcast %151 : vector<8x1xf32> to vector<8x32xf32>
    %155 = arith.mulf %154, %153 : vector<8x32xf32>
    %156 = vector.shape_cast %155 : vector<8x32xf32> to vector<1x8x32xf32>
    %c0_31 = arith.constant 0 : index
    %c0_32 = arith.constant 0 : index
    %c0_33 = arith.constant 0 : index
    %157 = vector.load %arg9[%c0_31, %c0_32, %c0_33] : memref<1x8x32xf32, #tpu.memory_space<vmem>>, vector<1x8x32xf32>
    tpu.vector_store %arg9[%c0_31, %c0_32, %c0_33], %156 {strides = array<i32>} : memref<1x8x32xf32, #tpu.memory_space<vmem>>, vector<1x8x32xf32>,
    %158 = vector.extract_strided_slice %143 {offsets = [0, 0], sizes = [8, 2], strides = [1, 1]} : vector<8x128xf32> to vector<8x2xf32>
    %159 = vector.shape_cast %158 : vector<8x2xf32> to vector<1x8x2xf32>
    %c0_34 = arith.constant 0 : index
    %c0_35 = arith.constant 0 : index
    %c0_36 = arith.constant 0 : index
    %160 = vector.load %arg10[%c0_34, %c0_35, %c0_36] : memref<1x8x2xf32, #tpu.memory_space<vmem>>, vector<1x8x2xf32>
    tpu.vector_store %arg10[%c0_34, %c0_35, %c0_36], %159 {strides = array<i32>} : memref<1x8x2xf32, #tpu.memory_space<vmem>>, vector<1x8x2xf32>,
    return
  }
  func.func @transform_0(%arg0: i32) -> (i32, i32, i32) {
    %c0_i32 = arith.constant 0 : i32
    %c0_i32_0 = arith.constant 0 : i32
    %c0_i32_1 = arith.constant 0 : i32
    return %arg0, %c0_i32, %c0_i32_0 : i32, i32, i32
  }
  func.func @transform_1(%arg0: i32) -> (i32, i32, i32) {
    %c0_i32 = arith.constant 0 : i32
    %c0_i32_0 = arith.constant 0 : i32
    %c0_i32_1 = arith.constant 0 : i32
    return %arg0, %c0_i32, %c0_i32_0 : i32, i32, i32
  }
  func.func @transform_2(%arg0: i32) -> (i32, i32, i32) {
    %c0_i32 = arith.constant 0 : i32
    %c0_i32_0 = arith.constant 0 : i32
    %c0_i32_1 = arith.constant 0 : i32
    %c0_i32_2 = arith.constant 0 : i32
    return %c0_i32, %c0_i32_0, %c0_i32_1 : i32, i32, i32
  }
  func.func @transform_3(%arg0: i32) -> (i32, i32) {
    %c0_i32 = arith.constant 0 : i32
    %c0_i32_0 = arith.constant 0 : i32
    %c0_i32_1 = arith.constant 0 : i32
    return %c0_i32, %c0_i32_0 : i32, i32
  }
  func.func @transform_4(%arg0: i32) -> (i32, i32) {
    %c0_i32 = arith.constant 0 : i32
    %c0_i32_0 = arith.constant 0 : i32
    %c0_i32_1 = arith.constant 0 : i32
    return %c0_i32, %c0_i32_0 : i32, i32
  }
  func.func @transform_5(%arg0: i32) -> (i32, i32) {
    %c0_i32 = arith.constant 0 : i32
    %c0_i32_0 = arith.constant 0 : i32
    %c0_i32_1 = arith.constant 0 : i32
    return %c0_i32, %c0_i32_0 : i32, i32
  }
  func.func @transform_6(%arg0: i32) -> (i32, i32) {
    %c0_i32 = arith.constant 0 : i32
    %c0_i32_0 = arith.constant 0 : i32
    %c0_i32_1 = arith.constant 0 : i32
    return %c0_i32, %c0_i32_0 : i32, i32
  }
  func.func @transform_7(%arg0: i32) -> (i32, i32) {
    %c0_i32 = arith.constant 0 : i32
    %c0_i32_0 = arith.constant 0 : i32
    %c0_i32_1 = arith.constant 0 : i32
    return %c0_i32, %c0_i32_0 : i32, i32
  }
  func.func @transform_8(%arg0: i32) -> (i32, i32, i32) {
    %c0_i32 = arith.constant 0 : i32
    %c0_i32_0 = arith.constant 0 : i32
    %c0_i32_1 = arith.constant 0 : i32
    return %arg0, %c0_i32, %c0_i32_0 : i32, i32, i32
  }
  func.func @transform_9(%arg0: i32) -> (i32, i32, i32) {
    %c0_i32 = arith.constant 0 : i32
    %c0_i32_0 = arith.constant 0 : i32
    %c0_i32_1 = arith.constant 0 : i32
    return %arg0, %c0_i32, %c0_i32_0 : i32, i32, i32
  }
}

module attributes {stable_mosaic.version = 11 : i64} {
  func.func @imask_kernel(%arg0: i32, %arg1: memref<1x8x32xf32, #tpu.memory_space<vmem>>, %arg2: memref<1x8x8xf32, #tpu.memory_space<vmem>>, %arg3: memref<2x32x32xf32, #tpu.memory_space<vmem>>, %arg4: memref<2x32xf32, #tpu.memory_space<vmem>>, %arg5: memref<32x16xf32, #tpu.memory_space<vmem>>, %arg6: memref<1x16xf32, #tpu.memory_space<vmem>>, %arg7: memref<16x128xf32, #tpu.memory_space<vmem>>, %arg8: memref<1x128xf32, #tpu.memory_space<vmem>>, %arg9: memref<1x8x32xf32, #tpu.memory_space<vmem>>, %arg10: memref<1x8x2xf32, #tpu.memory_space<vmem>>) attributes {dimension_semantics = [#tpu.dimension_semantics<parallel>], iteration_bounds = array<i64: 2>, scalar_prefetch = 0 : i64, scratch_operands = 0 : i64, tpu.core_type = #tpu.core_type<tc>, window_params = [{transform_indices = @transform_0, window_bounds = array<i64: 1, 8, 32>}, {transform_indices = @transform_1, window_bounds = array<i64: 1, 8, 8>}, {pipeline_mode = #tpu.pipeline_mode<synchronous>, transform_indices = @transform_2, window_bounds = array<i64: 2, 32, 32>}, {pipeline_mode = #tpu.pipeline_mode<synchronous>, transform_indices = @transform_3, window_bounds = array<i64: 2, 32>}, {pipeline_mode = #tpu.pipeline_mode<synchronous>, transform_indices = @transform_4, window_bounds = array<i64: 32, 16>}, {pipeline_mode = #tpu.pipeline_mode<synchronous>, transform_indices = @transform_5, window_bounds = array<i64: 1, 16>}, {pipeline_mode = #tpu.pipeline_mode<synchronous>, transform_indices = @transform_6, window_bounds = array<i64: 16, 128>}, {pipeline_mode = #tpu.pipeline_mode<synchronous>, transform_indices = @transform_7, window_bounds = array<i64: 1, 128>}, {transform_indices = @transform_8, window_bounds = array<i64: 1, 8, 32>}, {transform_indices = @transform_9, window_bounds = array<i64: 1, 8, 2>}]} {
    %c0 = arith.constant 0 : index
    %c0_0 = arith.constant 0 : index
    %c0_1 = arith.constant 0 : index
    %0 = vector.load %arg1[%c0, %c0_0, %c0_1] : memref<1x8x32xf32, #tpu.memory_space<vmem>>, vector<1x8x32xf32>
    %c0_2 = arith.constant 0 : index
    %c0_3 = arith.constant 0 : index
    %c0_4 = arith.constant 0 : index
    %1 = vector.load %arg2[%c0_2, %c0_3, %c0_4] : memref<1x8x8xf32, #tpu.memory_space<vmem>>, vector<1x8x8xf32>
    %2 = tpu.iota {dimensions = array<i32: 0>} : vector<8x8xi32>
    %3 = tpu.iota {dimensions = array<i32: 1>} : vector<8x8xi32>
    %4 = arith.cmpi eq, %2, %3 : vector<8x8xi32>
    %5 = vector.shape_cast %4 : vector<8x8xi1> to vector<1x8x8xi1>
    %cst = arith.constant 1.000000e+00 : f32
    %6 = vector.broadcast %cst : f32 to vector<1x8x8xf32>
    %7 = arith.select %5, %6, %1 : vector<1x8x8xi1>, vector<1x8x8xf32>
    %cst_5 = arith.constant dense<0.000000e+00> : vector<1x8xf32>
    %8 = vector.multi_reduction <add>, %7, %cst_5 [2] : vector<1x8x8xf32> to vector<1x8xf32>
    %9 = vector.shape_cast %8 : vector<1x8xf32> to vector<1x8x1xf32>
    %10 = math.rsqrt %9 : vector<1x8x1xf32>
    %cst_6 = arith.constant dense<0.000000e+00> : vector<1x8xf32>
    %11 = vector.multi_reduction <add>, %7, %cst_6 [2] : vector<1x8x8xf32> to vector<1x8xf32>
    %12 = math.rsqrt %11 : vector<1x8xf32>
    %13 = vector.shape_cast %12 : vector<1x8xf32> to vector<1x1x8xf32>
    %14 = vector.broadcast %10 : vector<1x8x1xf32> to vector<1x8x8xf32>
    %15 = arith.mulf %7, %14 : vector<1x8x8xf32>
    %16 = vector.broadcast %13 : vector<1x1x8xf32> to vector<1x8x8xf32>
    %17 = arith.mulf %15, %16 : vector<1x8x8xf32>
    %18 = vector.extract_strided_slice %17 {offsets = [0, 0, 0], sizes = [1, 8, 1], strides = [1, 1, 1]} : vector<1x8x8xf32> to vector<1x8x1xf32>
    %19 = vector.extract_strided_slice %0 {offsets = [0, 0, 0], sizes = [1, 1, 32], strides = [1, 1, 1]} : vector<1x8x32xf32> to vector<1x1x32xf32>
    %20 = vector.broadcast %18 : vector<1x8x1xf32> to vector<1x8x32xf32>
    %21 = vector.broadcast %19 : vector<1x1x32xf32> to vector<1x8x32xf32>
    %22 = arith.mulf %20, %21 : vector<1x8x32xf32>
    %23 = vector.extract_strided_slice %17 {offsets = [0, 0, 1], sizes = [1, 8, 1], strides = [1, 1, 1]} : vector<1x8x8xf32> to vector<1x8x1xf32>
    %24 = vector.extract_strided_slice %0 {offsets = [0, 1, 0], sizes = [1, 1, 32], strides = [1, 1, 1]} : vector<1x8x32xf32> to vector<1x1x32xf32>
    %25 = vector.broadcast %23 : vector<1x8x1xf32> to vector<1x8x32xf32>
    %26 = vector.broadcast %24 : vector<1x1x32xf32> to vector<1x8x32xf32>
    %27 = arith.mulf %25, %26 : vector<1x8x32xf32>
    %28 = arith.addf %22, %27 : vector<1x8x32xf32>
    %29 = vector.extract_strided_slice %17 {offsets = [0, 0, 2], sizes = [1, 8, 1], strides = [1, 1, 1]} : vector<1x8x8xf32> to vector<1x8x1xf32>
    %30 = vector.extract_strided_slice %0 {offsets = [0, 2, 0], sizes = [1, 1, 32], strides = [1, 1, 1]} : vector<1x8x32xf32> to vector<1x1x32xf32>
    %31 = vector.broadcast %29 : vector<1x8x1xf32> to vector<1x8x32xf32>
    %32 = vector.broadcast %30 : vector<1x1x32xf32> to vector<1x8x32xf32>
    %33 = arith.mulf %31, %32 : vector<1x8x32xf32>
    %34 = arith.addf %28, %33 : vector<1x8x32xf32>
    %35 = vector.extract_strided_slice %17 {offsets = [0, 0, 3], sizes = [1, 8, 1], strides = [1, 1, 1]} : vector<1x8x8xf32> to vector<1x8x1xf32>
    %36 = vector.extract_strided_slice %0 {offsets = [0, 3, 0], sizes = [1, 1, 32], strides = [1, 1, 1]} : vector<1x8x32xf32> to vector<1x1x32xf32>
    %37 = vector.broadcast %35 : vector<1x8x1xf32> to vector<1x8x32xf32>
    %38 = vector.broadcast %36 : vector<1x1x32xf32> to vector<1x8x32xf32>
    %39 = arith.mulf %37, %38 : vector<1x8x32xf32>
    %40 = arith.addf %34, %39 : vector<1x8x32xf32>
    %41 = vector.extract_strided_slice %17 {offsets = [0, 0, 4], sizes = [1, 8, 1], strides = [1, 1, 1]} : vector<1x8x8xf32> to vector<1x8x1xf32>
    %42 = vector.extract_strided_slice %0 {offsets = [0, 4, 0], sizes = [1, 1, 32], strides = [1, 1, 1]} : vector<1x8x32xf32> to vector<1x1x32xf32>
    %43 = vector.broadcast %41 : vector<1x8x1xf32> to vector<1x8x32xf32>
    %44 = vector.broadcast %42 : vector<1x1x32xf32> to vector<1x8x32xf32>
    %45 = arith.mulf %43, %44 : vector<1x8x32xf32>
    %46 = arith.addf %40, %45 : vector<1x8x32xf32>
    %47 = vector.extract_strided_slice %17 {offsets = [0, 0, 5], sizes = [1, 8, 1], strides = [1, 1, 1]} : vector<1x8x8xf32> to vector<1x8x1xf32>
    %48 = vector.extract_strided_slice %0 {offsets = [0, 5, 0], sizes = [1, 1, 32], strides = [1, 1, 1]} : vector<1x8x32xf32> to vector<1x1x32xf32>
    %49 = vector.broadcast %47 : vector<1x8x1xf32> to vector<1x8x32xf32>
    %50 = vector.broadcast %48 : vector<1x1x32xf32> to vector<1x8x32xf32>
    %51 = arith.mulf %49, %50 : vector<1x8x32xf32>
    %52 = arith.addf %46, %51 : vector<1x8x32xf32>
    %53 = vector.extract_strided_slice %17 {offsets = [0, 0, 6], sizes = [1, 8, 1], strides = [1, 1, 1]} : vector<1x8x8xf32> to vector<1x8x1xf32>
    %54 = vector.extract_strided_slice %0 {offsets = [0, 6, 0], sizes = [1, 1, 32], strides = [1, 1, 1]} : vector<1x8x32xf32> to vector<1x1x32xf32>
    %55 = vector.broadcast %53 : vector<1x8x1xf32> to vector<1x8x32xf32>
    %56 = vector.broadcast %54 : vector<1x1x32xf32> to vector<1x8x32xf32>
    %57 = arith.mulf %55, %56 : vector<1x8x32xf32>
    %58 = arith.addf %52, %57 : vector<1x8x32xf32>
    %59 = vector.extract_strided_slice %17 {offsets = [0, 0, 7], sizes = [1, 8, 1], strides = [1, 1, 1]} : vector<1x8x8xf32> to vector<1x8x1xf32>
    %60 = vector.extract_strided_slice %0 {offsets = [0, 7, 0], sizes = [1, 1, 32], strides = [1, 1, 1]} : vector<1x8x32xf32> to vector<1x1x32xf32>
    %61 = vector.broadcast %59 : vector<1x8x1xf32> to vector<1x8x32xf32>
    %62 = vector.broadcast %60 : vector<1x1x32xf32> to vector<1x8x32xf32>
    %63 = arith.mulf %61, %62 : vector<1x8x32xf32>
    %64 = arith.addf %58, %63 : vector<1x8x32xf32>
    %65 = vector.shape_cast %64 : vector<1x8x32xf32> to vector<8x32xf32>
    %c0_7 = arith.constant 0 : index
    %c0_8 = arith.constant 0 : index
    %c0_9 = arith.constant 0 : index
    %66 = vector.load %arg3[%c0_7, %c0_8, %c0_9] : memref<2x32x32xf32, #tpu.memory_space<vmem>>, vector<1x32x32xf32>
    %67 = vector.shape_cast %66 : vector<1x32x32xf32> to vector<32x32xf32>
    %cst_10 = arith.constant dense<0.000000e+00> : vector<8x32xf32>
    %68 = tpu.matmul %65, %67, %cst_10 {dimension_numbers = #tpu.dot_dimension_numbers<[1], [0], [0], [1], [0, 0, 1, 1], [], []>} : vector<8x32xf32>, vector<32x32xf32>, vector<8x32xf32> -> vector<8x32xf32>
    %c0_11 = arith.constant 0 : index
    %c0_12 = arith.constant 0 : index
    %69 = vector.load %arg4[%c0_11, %c0_12] : memref<2x32xf32, #tpu.memory_space<vmem>>, vector<1x32xf32>
    %70 = vector.broadcast %69 : vector<1x32xf32> to vector<8x32xf32>
    %71 = arith.addf %68, %70 : vector<8x32xf32>
    %cst_13 = arith.constant 0.000000e+00 : f32
    %72 = vector.broadcast %cst_13 : f32 to vector<8x32xf32>
    %73 = arith.maximumf %71, %72 : vector<8x32xf32>
    %74 = vector.shape_cast %73 : vector<8x32xf32> to vector<1x8x32xf32>
    %75 = vector.extract_strided_slice %17 {offsets = [0, 0, 0], sizes = [1, 8, 1], strides = [1, 1, 1]} : vector<1x8x8xf32> to vector<1x8x1xf32>
    %76 = vector.extract_strided_slice %74 {offsets = [0, 0, 0], sizes = [1, 1, 32], strides = [1, 1, 1]} : vector<1x8x32xf32> to vector<1x1x32xf32>
    %77 = vector.broadcast %75 : vector<1x8x1xf32> to vector<1x8x32xf32>
    %78 = vector.broadcast %76 : vector<1x1x32xf32> to vector<1x8x32xf32>
    %79 = arith.mulf %77, %78 : vector<1x8x32xf32>
    %80 = vector.extract_strided_slice %17 {offsets = [0, 0, 1], sizes = [1, 8, 1], strides = [1, 1, 1]} : vector<1x8x8xf32> to vector<1x8x1xf32>
    %81 = vector.extract_strided_slice %74 {offsets = [0, 1, 0], sizes = [1, 1, 32], strides = [1, 1, 1]} : vector<1x8x32xf32> to vector<1x1x32xf32>
    %82 = vector.broadcast %80 : vector<1x8x1xf32> to vector<1x8x32xf32>
    %83 = vector.broadcast %81 : vector<1x1x32xf32> to vector<1x8x32xf32>
    %84 = arith.mulf %82, %83 : vector<1x8x32xf32>
    %85 = arith.addf %79, %84 : vector<1x8x32xf32>
    %86 = vector.extract_strided_slice %17 {offsets = [0, 0, 2], sizes = [1, 8, 1], strides = [1, 1, 1]} : vector<1x8x8xf32> to vector<1x8x1xf32>
    %87 = vector.extract_strided_slice %74 {offsets = [0, 2, 0], sizes = [1, 1, 32], strides = [1, 1, 1]} : vector<1x8x32xf32> to vector<1x1x32xf32>
    %88 = vector.broadcast %86 : vector<1x8x1xf32> to vector<1x8x32xf32>
    %89 = vector.broadcast %87 : vector<1x1x32xf32> to vector<1x8x32xf32>
    %90 = arith.mulf %88, %89 : vector<1x8x32xf32>
    %91 = arith.addf %85, %90 : vector<1x8x32xf32>
    %92 = vector.extract_strided_slice %17 {offsets = [0, 0, 3], sizes = [1, 8, 1], strides = [1, 1, 1]} : vector<1x8x8xf32> to vector<1x8x1xf32>
    %93 = vector.extract_strided_slice %74 {offsets = [0, 3, 0], sizes = [1, 1, 32], strides = [1, 1, 1]} : vector<1x8x32xf32> to vector<1x1x32xf32>
    %94 = vector.broadcast %92 : vector<1x8x1xf32> to vector<1x8x32xf32>
    %95 = vector.broadcast %93 : vector<1x1x32xf32> to vector<1x8x32xf32>
    %96 = arith.mulf %94, %95 : vector<1x8x32xf32>
    %97 = arith.addf %91, %96 : vector<1x8x32xf32>
    %98 = vector.extract_strided_slice %17 {offsets = [0, 0, 4], sizes = [1, 8, 1], strides = [1, 1, 1]} : vector<1x8x8xf32> to vector<1x8x1xf32>
    %99 = vector.extract_strided_slice %74 {offsets = [0, 4, 0], sizes = [1, 1, 32], strides = [1, 1, 1]} : vector<1x8x32xf32> to vector<1x1x32xf32>
    %100 = vector.broadcast %98 : vector<1x8x1xf32> to vector<1x8x32xf32>
    %101 = vector.broadcast %99 : vector<1x1x32xf32> to vector<1x8x32xf32>
    %102 = arith.mulf %100, %101 : vector<1x8x32xf32>
    %103 = arith.addf %97, %102 : vector<1x8x32xf32>
    %104 = vector.extract_strided_slice %17 {offsets = [0, 0, 5], sizes = [1, 8, 1], strides = [1, 1, 1]} : vector<1x8x8xf32> to vector<1x8x1xf32>
    %105 = vector.extract_strided_slice %74 {offsets = [0, 5, 0], sizes = [1, 1, 32], strides = [1, 1, 1]} : vector<1x8x32xf32> to vector<1x1x32xf32>
    %106 = vector.broadcast %104 : vector<1x8x1xf32> to vector<1x8x32xf32>
    %107 = vector.broadcast %105 : vector<1x1x32xf32> to vector<1x8x32xf32>
    %108 = arith.mulf %106, %107 : vector<1x8x32xf32>
    %109 = arith.addf %103, %108 : vector<1x8x32xf32>
    %110 = vector.extract_strided_slice %17 {offsets = [0, 0, 6], sizes = [1, 8, 1], strides = [1, 1, 1]} : vector<1x8x8xf32> to vector<1x8x1xf32>
    %111 = vector.extract_strided_slice %74 {offsets = [0, 6, 0], sizes = [1, 1, 32], strides = [1, 1, 1]} : vector<1x8x32xf32> to vector<1x1x32xf32>
    %112 = vector.broadcast %110 : vector<1x8x1xf32> to vector<1x8x32xf32>
    %113 = vector.broadcast %111 : vector<1x1x32xf32> to vector<1x8x32xf32>
    %114 = arith.mulf %112, %113 : vector<1x8x32xf32>
    %115 = arith.addf %109, %114 : vector<1x8x32xf32>
    %116 = vector.extract_strided_slice %17 {offsets = [0, 0, 7], sizes = [1, 8, 1], strides = [1, 1, 1]} : vector<1x8x8xf32> to vector<1x8x1xf32>
    %117 = vector.extract_strided_slice %74 {offsets = [0, 7, 0], sizes = [1, 1, 32], strides = [1, 1, 1]} : vector<1x8x32xf32> to vector<1x1x32xf32>
    %118 = vector.broadcast %116 : vector<1x8x1xf32> to vector<1x8x32xf32>
    %119 = vector.broadcast %117 : vector<1x1x32xf32> to vector<1x8x32xf32>
    %120 = arith.mulf %118, %119 : vector<1x8x32xf32>
    %121 = arith.addf %115, %120 : vector<1x8x32xf32>
    %122 = vector.shape_cast %121 : vector<1x8x32xf32> to vector<8x32xf32>
    %c1 = arith.constant 1 : index
    %c0_14 = arith.constant 0 : index
    %c0_15 = arith.constant 0 : index
    %123 = vector.load %arg3[%c1, %c0_14, %c0_15] : memref<2x32x32xf32, #tpu.memory_space<vmem>>, vector<1x32x32xf32>
    %124 = vector.shape_cast %123 : vector<1x32x32xf32> to vector<32x32xf32>
    %cst_16 = arith.constant dense<0.000000e+00> : vector<8x32xf32>
    %125 = tpu.matmul %122, %124, %cst_16 {dimension_numbers = #tpu.dot_dimension_numbers<[1], [0], [0], [1], [0, 0, 1, 1], [], []>} : vector<8x32xf32>, vector<32x32xf32>, vector<8x32xf32> -> vector<8x32xf32>
    %c1_17 = arith.constant 1 : index
    %c0_18 = arith.constant 0 : index
    %126 = vector.load %arg4[%c1_17, %c0_18] : memref<2x32xf32, #tpu.memory_space<vmem>>, vector<1x32xf32>
    %127 = vector.broadcast %126 : vector<1x32xf32> to vector<8x32xf32>
    %128 = arith.addf %125, %127 : vector<8x32xf32>
    %cst_19 = arith.constant 0.000000e+00 : f32
    %129 = vector.broadcast %cst_19 : f32 to vector<8x32xf32>
    %130 = arith.maximumf %128, %129 : vector<8x32xf32>
    %131 = vector.shape_cast %130 : vector<8x32xf32> to vector<1x8x32xf32>
    %132 = vector.shape_cast %131 : vector<1x8x32xf32> to vector<8x32xf32>
    %c0_20 = arith.constant 0 : index
    %c0_21 = arith.constant 0 : index
    %133 = vector.load %arg5[%c0_20, %c0_21] : memref<32x16xf32, #tpu.memory_space<vmem>>, vector<32x16xf32>
    %cst_22 = arith.constant dense<0.000000e+00> : vector<8x16xf32>
    %134 = tpu.matmul %132, %133, %cst_22 {dimension_numbers = #tpu.dot_dimension_numbers<[1], [0], [0], [1], [0, 0, 1, 1], [], []>} : vector<8x32xf32>, vector<32x16xf32>, vector<8x16xf32> -> vector<8x16xf32>
    %c0_23 = arith.constant 0 : index
    %c0_24 = arith.constant 0 : index
    %135 = vector.load %arg6[%c0_23, %c0_24] : memref<1x16xf32, #tpu.memory_space<vmem>>, vector<1x16xf32>
    %136 = vector.broadcast %135 : vector<1x16xf32> to vector<8x16xf32>
    %137 = arith.addf %134, %136 : vector<8x16xf32>
    %138 = math.tanh %137 : vector<8x16xf32>
    %c0_25 = arith.constant 0 : index
    %c0_26 = arith.constant 0 : index
    %139 = vector.load %arg7[%c0_25, %c0_26] : memref<16x128xf32, #tpu.memory_space<vmem>>, vector<16x128xf32>
    %cst_27 = arith.constant dense<0.000000e+00> : vector<8x128xf32>
    %140 = tpu.matmul %138, %139, %cst_27 {dimension_numbers = #tpu.dot_dimension_numbers<[1], [0], [0], [1], [0, 0, 1, 1], [], []>} : vector<8x16xf32>, vector<16x128xf32>, vector<8x128xf32> -> vector<8x128xf32>
    %c0_28 = arith.constant 0 : index
    %c0_29 = arith.constant 0 : index
    %141 = vector.load %arg8[%c0_28, %c0_29] : memref<1x128xf32, #tpu.memory_space<vmem>>, vector<1x128xf32>
    %142 = vector.broadcast %141 : vector<1x128xf32> to vector<8x128xf32>
    %143 = arith.addf %140, %142 : vector<8x128xf32>
    %144 = vector.extract_strided_slice %143 {offsets = [0, 1], sizes = [8, 1], strides = [1, 1]} : vector<8x128xf32> to vector<8x1xf32>
    %145 = vector.extract_strided_slice %143 {offsets = [0, 0], sizes = [8, 1], strides = [1, 1]} : vector<8x128xf32> to vector<8x1xf32>
    %146 = arith.subf %144, %145 : vector<8x1xf32>
    %147 = arith.negf %146 : vector<8x1xf32>
    %148 = math.exp %147 : vector<8x1xf32>
    %cst_30 = arith.constant 1.000000e+00 : f32
    %149 = vector.broadcast %cst_30 : f32 to vector<8x1xf32>
    %150 = arith.addf %149, %148 : vector<8x1xf32>
    %151 = arith.divf %149, %150 : vector<8x1xf32>
    %152 = vector.shape_cast %0 : vector<1x8x32xf32> to vector<8x32xf32>
    %153 = arith.addf %152, %132 : vector<8x32xf32>
    %154 = vector.broadcast %151 : vector<8x1xf32> to vector<8x32xf32>
    %155 = arith.mulf %154, %153 : vector<8x32xf32>
    %156 = vector.shape_cast %155 : vector<8x32xf32> to vector<1x8x32xf32>
    %c0_31 = arith.constant 0 : index
    %c0_32 = arith.constant 0 : index
    %c0_33 = arith.constant 0 : index
    %157 = vector.load %arg9[%c0_31, %c0_32, %c0_33] : memref<1x8x32xf32, #tpu.memory_space<vmem>>, vector<1x8x32xf32>
    tpu.vector_store %arg9[%c0_31, %c0_32, %c0_33], %156 {strides = array<i32>} : memref<1x8x32xf32, #tpu.memory_space<vmem>>, vector<1x8x32xf32>,
    %158 = vector.extract_strided_slice %143 {offsets = [0, 0], sizes = [8, 2], strides = [1, 1]} : vector<8x128xf32> to vector<8x2xf32>
    %159 = vector.shape_cast %158 : vector<8x2xf32> to vector<1x8x2xf32>
    %c0_34 = arith.constant 0 : index
    %c0_35 = arith.constant 0 : index
    %c0_36 = arith.constant 0 : index
    %160 = vector.load %arg10[%c0_34, %c0_35, %c0_36] : memref<1x8x2xf32, #tpu.memory_space<vmem>>, vector<1x8x2xf32>
    tpu.vector_store %arg10[%c0_34, %c0_35, %c0_36], %159 {strides = array<i32>} : memref<1x8x2xf32, #tpu.memory_space<vmem>>, vector<1x8x2xf32>,
    return
  }
  func.func @transform_0(%arg0: i32) -> (i32, i32, i32) {
    %c0_i32 = arith.constant 0 : i32
    %c0_i32_0 = arith.constant 0 : i32
    %c0_i32_1 = arith.constant 0 : i32
    return %arg0, %c0_i32, %c0_i32_0 : i32, i32, i32
  }
  func.func @transform_1(%arg0: i32) -> (i32, i32, i32) {
    %c0_i32 = arith.constant 0 : i32
    %c0_i32_0 = arith.constant 0 : i32
    %c0_i32_1 = arith.constant 0 : i32
    return %arg0, %c0_i32, %c0_i32_0 : i32, i32, i32
  }
  func.func @transform_2(%arg0: i32) -> (i32, i32, i32) {
    %c0_i32 = arith.constant 0 : i32
    %c0_i32_0 = arith.constant 0 : i32
    %c0_i32_1 = arith.constant 0 : i32
    %c0_i32_2 = arith.constant 0 : i32
    return %c0_i32, %c0_i32_0, %c0_i32_1 : i32, i32, i32
  }
  func.func @transform_3(%arg0: i32) -> (i32, i32) {
    %c0_i32 = arith.constant 0 : i32
    %c0_i32_0 = arith.constant 0 : i32
    %c0_i32_1 = arith.constant 0 : i32
    return %c0_i32, %c0_i32_0 : i32, i32
  }
  func.func @transform_4(%arg0: i32) -> (i32, i32) {
    %c0_i32 = arith.constant 0 : i32
    %c0_i32_0 = arith.constant 0 : i32
    %c0_i32_1 = arith.constant 0 : i32
    return %c0_i32, %c0_i32_0 : i32, i32
  }
  func.func @transform_5(%arg0: i32) -> (i32, i32) {
    %c0_i32 = arith.constant 0 : i32
    %c0_i32_0 = arith.constant 0 : i32
    %c0_i32_1 = arith.constant 0 : i32
    return %c0_i32, %c0_i32_0 : i32, i32
  }
  func.func @transform_6(%arg0: i32) -> (i32, i32) {
    %c0_i32 = arith.constant 0 : i32
    %c0_i32_0 = arith.constant 0 : i32
    %c0_i32_1 = arith.constant 0 : i32
    return %c0_i32, %c0_i32_0 : i32, i32
  }
  func.func @transform_7(%arg0: i32) -> (i32, i32) {
    %c0_i32 = arith.constant 0 : i32
    %c0_i32_0 = arith.constant 0 : i32
    %c0_i32_1 = arith.constant 0 : i32
    return %c0_i32, %c0_i32_0 : i32, i32
  }
  func.func @transform_8(%arg0: i32) -> (i32, i32, i32) {
    %c0_i32 = arith.constant 0 : i32
    %c0_i32_0 = arith.constant 0 : i32
    %c0_i32_1 = arith.constant 0 : i32
    return %arg0, %c0_i32, %c0_i32_0 : i32, i32, i32
  }
  func.func @transform_9(%arg0: i32) -> (i32, i32, i32) {
    %c0_i32 = arith.constant 0 : i32
    %c0_i32_0 = arith.constant 0 : i32
    %c0_i32_1 = arith.constant 0 : i32
    return %arg0, %c0_i32, %c0_i32_0 : i32, i32, i32
  }
}

</mosaic_0001>

<bundles_post_ra>
// kernel: tpu_custom_call.1
= control target key start
LH: loop header
LB: loop body
LE: loop exit
PB: predicated region body
PF: predicated region fallthrough
CT: control target
= control target key end

     0   :  { %15 = vsyncpa [#allocation3], 0  ;;  %s1596_s0 = inlined_call_operand.vmem [shape: f32[2,8,32], index: 0, kind: input, shape index: {}]   ;;  %s1597_s1 = inlined_call_operand.vmem [shape: f32[2,8,8], index: 1, kind: input, shape index: {}]   ;;  %s1598_s2 = inlined_call_operand.hbm [shape: f32[2,32,32], index: 2, kind: input, shape index: {}]   ;;  %s1599_s3 = inlined_call_operand.vmem [shape: f32[2,32], index: 3, kind: input, shape index: {}]   ;;  %s1600_s4 = inlined_call_operand.vmem [shape: f32[32,16], index: 4, kind: input, shape index: {}]   ;;  %s1601_s5 = inlined_call_operand.vmem [shape: f32[1,16], index: 5, kind: input, shape index: {}]   ;;  %s1602_s6 = inlined_call_operand.vmem [shape: f32[16,128], index: 6, kind: input, shape index: {}]   ;;  %s1603_s7 = inlined_call_operand.vmem [shape: f32[1,128], index: 7, kind: input, shape index: {}]   ;;  %s1604_s8 = inlined_call_operand.hbm [shape: f32[2,8,32], index: 8, kind: output, shape index: {0}]   ;;  %s1605_s9 = inlined_call_operand.vmem [shape: f32[2,8,2], index: 9, kind: output, shape index: {1}]  }
   0x1   :  { %16 = vsyncpa [#allocation4], 0 }
   0x2   :  { %18 = vsyncpa [#allocation4 + $0x1], 0  ;;  %s1362_s30 = smov 0   ;;  %s1364_s10 = smov 0  }
   0x3   :  { %s1366_s11 = smov 0   ;;  %s1368_s12 = smov 0  }
   0x4 LB: > { %s1383_s13 = sadd.s32 4294967295, %s1294_s12   ;;  %s1016_s14 = sadd.s32 4294967294, %s1294_s12   ;;  %s1294_s12 = sphi %s1368_s12, %s1621_s12   ;;  %s1290_s11 = sphi %s1366_s11, %s1620_s11   ;;  %s1286_s10 = sphi %s1364_s10, %s1619_s10   ;;  %s1282_s30 = sphi %s1362_s30, %s1618_s30  }
   0x5   : > { %s1387_s15 = sadd.s32 1, %s1294_s12   ;;  %s209_s16 = sadd.s32 1, %s1290_s11 }
   0x6   : > { %s206_s17 = ssub.s32 %s1294_s12, %s1387_s15  ;;  %p219_p0 = scmp.ne.s32.totalorder %s1290_s11, %s1286_s10 }
   0x7   : > { %p207_p1 = scmp.eq.s32.totalorder %s206_s17, 0  ;;  %p220_p2 = scmp.eq.s32.totalorder %s1383_s13, 1 }
   0x8   : > { %p225_p3 = scmp.ne.s32.totalorder %s1286_s10, %s1282_s30  ;;  %p226_p4 = scmp.eq.s32.totalorder %s1016_s14, 1 }
   0x9   : > { %s1398_s18 = scalar_select %p207_p1, %s1290_s11, %s209_s16  }
   0xa   : > { %p1400_p5 = por %p220_p2, %p219_p0  ;;  %p1404_p6 = por %p226_p4, %p225_p3 }
   0xb   : > { %p1017_p7 = scmp.ge.s32.totalorder %s1294_s12, 1  ;;  %p259_p8 = scmp.lt.s32.totalorder %s1294_s12, 3 }
   0xc   : > { %s1609_s19 = scalar_select %p1400_p5, 1, 0 }
   0xd   : > { %s1610_s20 = scalar_select %p1404_p6, 1, 0 }
   0xe   : > { %p1606_p9 = scmp.eq.s32.totalorder %s1383_s13, 0  ;;  %p1411_p10 = pnand %p1017_p7, %p259_p8 }
   0xf   : > { %s1296_s22 = smov [#allocation2]   ;;  %s1200_s27 = scalar_lea.hbm %s1598_s2, 1024 }
  0x10   : > { %s1611_s21 = scalar_select %p1411_p10, 1, 0 }
  0x11   : > { %s271_s23 = sshll.u32 %s1296_s22, 4  ;;  %p1124_p11 = pneg %p1411_p10  ;;  %s272_s23 = int_to_ptr.vmem [resolvable:$true] %s271_s23 }
  0x12   : > { %p1201_p13 = scmp.ne.s32.totalorder %s1598_s2, %s1200_s27  ;;  %p1207_p3 = scmp.lt.u32.totalorder %s1200_s27, %s1598_s2 }
  0x13   : > { %p1419_p12 = pnand %p1606_p9, %p1124_p11 }
  0x15   : > { %p1202_p0 = pneg %p1419_p12 }
  0x17   : > { %p1203_p1 = pnand %p1202_p0, %p1201_p13 }
  0x19   : > { %p1204_p2 = pneg %p1203_p1 }
  0x1b   : > { %p1209_p4 = pnand %p1207_p3, %p1204_p2 }
  0x1d   : > { %1212 = shalt.err (!%p1209_p4)
}
  0x1e   : > { %s1213_s17 = scalar_lea.vmem %s272_s23, 1024  ;;  %p1221_p9 = scmp.lt.s32.totalorder %s272_s23, %s272_s23 }
  0x1f   : > { %p1214_p7 = scmp.ne.s32.totalorder %s272_s23, %s1213_s17  ;;  %p1222_p6 = scmp.lt.s32.totalorder %s1213_s17, %s1213_s17 }
  0x21   : > { %p1216_p8 = pnand %p1214_p7, %p1202_p0  ;;  %p1223_p5 = por %p1222_p6, %p1221_p9 }
  0x23   : > { %p1217_p11 = pneg %p1216_p8 }
  0x25   : > { %p1224_p10 = pnand %p1223_p5, %p1217_p11 }
  0x27   : > { %1227 = shalt.err (!%p1224_p10)
}
  0x28   : > { %s1297_s22 = smov 128   ;;  %s1298_s25 = smov 8  }
  0x29   : > { %1127 = dma.hbm_to_vmem [thread:$0]  (!%p1419_p12), %s1598_s2, 1024, %s272_s23, [#allocation3], %s1297_s22, %s1297_s22, %s1298_s25  }
  0x2a   : > { %p1613_p13 = scmp.ne.s32.totalorder %s1611_s21, 0 }
  0x2b   : > { %p1614_p1 = scmp.eq.s32.totalorder (!%p1613_p13), %s1383_s13, 0 }
  0x2c   : > { %316 = sbr.rel (%p1613_p13) target bundleno = 1556 (0x614), region = 52 }
  0x33   : > { %1273 = dma.done.wait (%p1614_p1), [#allocation3], 1024   ;;  %p1615_p0 = pmov %p1614_p1 }
  0x34   : > { %p359_p5 = scmp.lt.s32.totalorder %s1383_s13, 1  ;;  %v373_v0 = vlaneseq  ;;  %vm379_vm1 = vcmask 64512   ;;  %v1299_v6 = vmov 1   ;;  %v1300_v7 = vmov 0   ;;  %v484_v19 = vld [vmem:[#allocation2] sm:$0xff]  ;;  %v485_v20 = vld [vmem:[#allocation2 + $0x8] sm:$0xff] }
  0x35   : > { %1275 = vsyncadd (%p1615_p0), [#allocation3], 4294966272  ;;  %1183 = vset.pattern.permute.xlu1 %v1299_v6  ;;  %1182 = vset.pattern.permute.xlu0 %v1300_v7  ;;  %v1301_v14 = vmov 2   ;;  %v1302_v15 = vmov 3   ;;  %v1303_v16 = vmov 4   ;;  %v1304_v17 = vmov 5  }
  0x36   : > { %s360_s27 = scalar_select %p359_p5, %s1383_s13, 1  ;;  %v1447_v1 = vshrl.u32 %v373_v0, 7  ;;  %v376_v2 = vand.u32 127, %v373_v0  ;;  %v1305_v18 = vmov 6   ;;  %v1098_v21 = vpack.c.bf16 %v485_v20, %v484_v19  ;;  %v486_v23 = vld [vmem:[#allocation2 + $0x10] sm:$0xff]  ;;  %v487_v24 = vld [vmem:[#allocation2 + $0x18] sm:$0xff] }
  0x37   : > { %v1306_v22 = vmov 0.0|0.0   ;;  %v1307_v25 = vmov 7   ;;  %v1101_v26 = vpack.c.bf16 %v487_v24, %v486_v23  ;;  %vm1308_vm2 = vmmov 0   ;;  %s1310_s25 = smov 1   ;;  %s1036_s28 = sshll.u32 %s1383_s13, 7 }
  0x38   : > { %s1449_s24 = sshll.u32 %s360_s27, 3  ;;  %vm377_vm0 = vcmp.eq.s32.totalorder %v1447_v1, %v376_v2  ;;  %v388_v9 = vsub.s32 %v376_v2, %v1447_v1  ;;  %1097 = vmatprep.subr.bf16.mxu0 %v1306_v22  ;;  %1103 = vmatprep.subr.bf16.mxu1 %v1306_v22  ;;  %v1309_v27 = vmov 0.0   ;;  %v420_v30 = vsub.s32 1, %v1447_v1  ;;  %s1553_s14 = scalar_lea.hbm %s1604_s8, %s1036_s28 }
  0x39   : > { %s366_s29 = scalar_lea.vmem %s1597_s1, %s1449_s24  ;;  %1099 = vmatpush3.bf16.msra.mxu0 %v1098_v21  ;;  %1065 = vmatprep.mubr.msk.f32.mxu0 %vm1308_vm2, %v1309_v27  ;;  %s362_s17 = scalar_lea.vmem %s1596_s0, %s1449_s24  ;;  %v411_v31 = vsub.s32 0, %v1447_v1  ;;  %v430_v34 = vsub.s32 2, %v1447_v1  ;;  %v440_v37 = vsub.s32 3, %v1447_v1  ;;  %v450_v40 = vsub.s32 4, %v1447_v1 }
  0x3a   : > { %v372_v3 = vld [vmem:[%s366_s29] sm:$0xff]  ;;  %1100 = vmatprep.subr.bf16.mxu0 %v1306_v22  ;;  %1076 = vmatprep.mubr.msk.f32.mxu1 %vm1308_vm2, %v1309_v27  ;;  %v460_v45 = vsub.s32 5, %v1447_v1  ;;  %v470_v48 = vsub.s32 6, %v1447_v1  ;;  %v480_v56 = vsub.s32 7, %v1447_v1  ;;  %vm493_vm3 = vcmask 261120   ;;  %v617_v1 = vld [vmem:[#allocation2 + $0x28] sm:$0xff]  ;;  %s370_s22 = scalar_lea.vmem %s1605_s9, %s1449_s24 }
  0x3b   : > { %v378_v4 = vsel %vm377_vm0, 1.0, %v372_v3  ;;  %v1475_v32 = vld [vmem:[%s362_s17] sm:$0xff]  ;;  %vm793_vm4 = vcmask 130048   ;;  %vm886_vm5 = vcmask 15360   ;;  %s350_s24 = sand.u32 1, %s1286_s10   ;;  %p1616_p9 = scmp.ne.s32.totalorder %s1609_s19, 0 }
  0x3c   : > { %v380_v5 = vsel %vm379_vm1, %v378_v4, 0.0  ;;  %v421_v35 = vrot.slane %v1475_v32, %v420_v30  ;;  %v412_v36 = vrot.slane %v1475_v32, %v411_v31  ;;  %v431_v39 = vrot.slane %v1475_v32, %v430_v34  ;;  %s1022_s26 = sshll.u32 %s350_s24, 3  ;;  %s889_s16 = scalar_lea.sflag [#allocation4], %s350_s24 }
  0x3d   : > { %381 = vadd.xlane.f32.xlu0 %v380_v5  ;;  %1102 = vmatpush3.bf16.msra.mxu0 %v1101_v26  ;;  %v441_v44 = vrot.slane %v1475_v32, %v440_v37  ;;  %v451_v47 = vrot.slane %v1475_v32, %v450_v40  ;;  %v461_v52 = vrot.slane %v1475_v32, %v460_v45  ;;  %v616_v5 = vld [vmem:[#allocation2 + $0x20] sm:$0xff]  ;;  %s352_s27 = scalar_lea.vmem [#allocation5], %s1022_s26  ;;  %s1311_s17 = smov [#allocation5]  }
  0x3e   : > { %1109 = vmatprep.subr.bf16.mxu0 %v1306_v22  ;;  %v471_v55 = vrot.slane %v1475_v32, %v470_v48  ;;  %v481_v62 = vrot.slane %v1475_v32, %v480_v56  ;;  %v1104_v7 = vpack.c.bf16 %v617_v1, %v616_v5  ;;  %s906_s23 = sshll.u32 %s352_s27, 4  ;;  %s1555_s23 = int_to_ptr.vmem [resolvable:$true] %s906_s23 }
  0x3f   : > { %s1228_s13 = scalar_lea.vmem %s1555_s23, 128 }
  0x40   : > { %1105 = vmatpush3.bf16.msra.mxu1 %v1104_v7  ;;  %p1229_p6 = scmp.ne.s32.totalorder %s1555_s23, %s1228_s13 }
  0x41   : > { %1106 = vmatprep.subr.bf16.mxu1 %v1306_v22 }
  0x42   : > { %p1230_p10 = pnand %p1229_p6, %p1616_p9 }
  0x44   : > { %p1231_p12 = pneg %p1230_p10 }
  0xca   : > { %v382_v8 = vpop.xlane.xlu0 %381 }
  0xcb   : > { %1192 = vrsqrt.f32 %v382_v8  ;;  %v619_v8 = vld [vmem:[#allocation2 + $0x38] sm:$0xff] }
  0xd5   : > { %v1193_v10 = vpop.eup %1192 }
  0xd6   : > { %v384_v11 = vmul.f32 %v1193_v10, %v378_v4  ;;  %v389_v12 = vrot.slane %v1193_v10, %v388_v9  ;;  %v699_v10 = vld [vmem:[%s1600_s4] sm:$0xff] }
  0xd8   : > { %v403_v13 = vmul.f32 %v389_v12, %v384_v11  ;;  %v700_v11 = vld [vmem:[%s1600_s4 + $0x8] sm:$0xff] }
  0xd9   : > { %v1110_v12 = vpack.c.bf16 %v700_v11, %v699_v10 }
  0xda   : > { %415 = vperm.xlu1 %1183, %v403_v13   ;;  %406 = vperm.xlu0 %1182, %v403_v13  }
  0xde   : > { %1184 = vset.pattern.permute.xlu1 %v1301_v14  ;;  %1191 = vset.pattern.permute.xlu0 %v1299_v6 }
  0xdf   : > { %425 = vperm.xlu1 %1184, %v403_v13  }
  0xe3   : > { %1185 = vset.pattern.permute.xlu1 %v1302_v15 }
  0xe4   : > { %435 = vperm.xlu1 %1185, %v403_v13  }
  0xe8   : > { %1186 = vset.pattern.permute.xlu1 %v1303_v16 }
  0xe9   : > { %445 = vperm.xlu1 %1186, %v403_v13  }
  0xed   : > { %1187 = vset.pattern.permute.xlu1 %v1304_v17 }
  0xee   : > { %455 = vperm.xlu1 %1187, %v403_v13  }
  0xf2   : > { %1188 = vset.pattern.permute.xlu1 %v1305_v18 }
  0xf3   : > { %465 = vperm.xlu1 %1188, %v403_v13  }
  0xf7   : > { %1189 = vset.pattern.permute.xlu1 %v1307_v25 }
  0xf8   : > { %475 = vperm.xlu1 %1189, %v403_v13   ;;  %v1026_v13 = vld [vmem:[%s1599_s3] ss:$0 sm:$0xff] }
  0xfc   : > { %1190 = vset.pattern.permute.xlu1 %v1299_v6  ;;  %v618_v6 = vld [vmem:[#allocation2 + $0x30] sm:$0xff] }
  0xfd   : > { %v1107_v9 = vpack.c.bf16 %v619_v8, %v618_v6 }
  0xff   : > { %1108 = vmatpush3.bf16.msra.mxu1 %v1107_v9 }
 0x100   : > { %1115 = vmatprep.subr.bf16.mxu1 %v1306_v22 }
 0x159   : > { %v1465_v28 = vpop.permute.xlu1 %415  ;;  %v407_v38 = vpop.permute.xlu0 %406 }
 0x15a   : > { %v422_v42 = vmul.f32 %v421_v35, %v1465_v28  ;;  %v413_v43 = vmul.f32 %v412_v36, %v407_v38 }
 0x15c   : > { %v423_v50 = vadd.f32 %v422_v42, %v413_v43 }
 0x15e   : > { %v1467_v29 = vpop.permute.xlu1 %425 }
 0x15f   : > { %v432_v46 = vmul.f32 %v431_v39, %v1467_v29 }
 0x161   : > { %v433_v53 = vadd.f32 %v432_v46, %v423_v50 }
 0x163   : > { %v1477_v33 = vpop.permute.xlu1 %435 }
 0x164   : > { %v442_v51 = vmul.f32 %v441_v44, %v1477_v33 }
 0x166   : > { %v443_v57 = vadd.f32 %v442_v51, %v433_v53  ;;  %v785_v51 = vld [vmem:[%s1602_s6 + $0x8] sm:$0xff]  ;;  %v1030_v53 = vld [vmem:[%s1601_s5] ss:$0 sm:$0xff] }
 0x168   : > { %v1485_v41 = vpop.permute.xlu1 %445 }
 0x169   : > { %v452_v54 = vmul.f32 %v451_v47, %v1485_v41 }
 0x16b   : > { %v453_v60 = vadd.f32 %v452_v54, %v443_v57 }
 0x16d   : > { %v456_v49 = vpop.permute.xlu1 %455 }
 0x16e   : > { %v462_v58 = vmul.f32 %v461_v52, %v456_v49 }
 0x170   : > { %v463_v63 = vadd.f32 %v462_v58, %v453_v60  ;;  %v1032_v58 = vld [vmem:[%s1603_s7] ss:$0 sm:$0xff] }
 0x172   : > { %v466_v59 = vpop.permute.xlu1 %465 }
 0x173   : > { %v472_v61 = vmul.f32 %v471_v55, %v466_v59 }
 0x175   : > { %v473_v2 = vadd.f32 %v472_v61, %v463_v63 }
 0x177   : > { %v476_v0 = vpop.permute.xlu1 %475 }
 0x178   : > { %v482_v3 = vmul.f32 %v481_v62, %v476_v0 }
 0x17a   : > { %v483_v4 = vadd.f32 %v482_v3, %v473_v2 }
 0x17c   : > { %1066 = vmatmul.mubr.msk.f32.vlgmr.msra.gmra.mrb[0].mxu0 %vm493_vm3, %v483_v4 }
 0x17d   : > { %1087 = vmatprep.mubr.msk.f32.mxu0 %vm1308_vm2, %v1309_v27  ;;  %1111 = vmatpush3.bf16.msra.mxu0 %v1110_v12 }
 0x17e   : > { %1112 = vmatprep.subr.bf16.mxu0 %v1306_v22 }
 0x24f   : > { %v563_v14 = vpop.f32.mrb[0].mxu0 }
 0x250   : > { %v564_v15 = vadd.f32 %v1026_v13, %v563_v14  ;;  %v1067_v16 = vpop.f32.mrb[1].mxu0 }
 0x252   : > { %v567_v17 = vmax.f32 %v564_v15, 0.0 }
 0x254   : > { %v571_v18 = vrot.slane %v567_v17, %v411_v31  ;;  %v576_v19 = vrot.slane %v567_v17, %v420_v30  ;;  %v582_v20 = vrot.slane %v567_v17, %v430_v34  ;;  %v588_v24 = vrot.slane %v567_v17, %v440_v37 }
 0x255   : > { %v594_v35 = vrot.slane %v567_v17, %v450_v40  ;;  %v600_v39 = vrot.slane %v567_v17, %v460_v45  ;;  %v606_v44 = vrot.slane %v567_v17, %v470_v48  ;;  %v612_v30 = vrot.slane %v567_v17, %v480_v56 }
 0x256   : > { %v572_v21 = vmul.f32 %v571_v18, %v407_v38  ;;  %v577_v23 = vmul.f32 %v576_v19, %v1465_v28  ;;  %v583_v26 = vmul.f32 %v582_v20, %v1467_v29  ;;  %v589_v36 = vmul.f32 %v588_v24, %v1477_v33  ;;  %v701_v29 = vld [vmem:[%s1600_s4 + $0x10] sm:$0xff]  ;;  %v702_v33 = vld [vmem:[%s1600_s4 + $0x18] sm:$0xff] }
 0x257   : > { %v595_v43 = vmul.f32 %v594_v35, %v1485_v41  ;;  %v601_v31 = vmul.f32 %v600_v39, %v456_v49  ;;  %v607_v38 = vmul.f32 %v606_v44, %v466_v59  ;;  %v613_v28 = vmul.f32 %v612_v30, %v476_v0  ;;  %v1028_v41 = vld [vmem:[%s1599_s3 + $0x1] ss:$0 sm:$0xff] }
 0x258   : > { %v578_v25 = vadd.f32 %v577_v23, %v572_v21  ;;  %v1113_v40 = vpack.c.bf16 %v702_v33, %v701_v29 }
 0x25a   : > { %v584_v22 = vadd.f32 %v583_v26, %v578_v25  ;;  %1114 = vmatpush3.bf16.msra.mxu0 %v1113_v40 }
 0x25c   : > { %v590_v42 = vadd.f32 %v589_v36, %v584_v22 }
 0x25e   : > { %v596_v46 = vadd.f32 %v595_v43, %v590_v42 }
 0x260   : > { %v602_v34 = vadd.f32 %v601_v31, %v596_v46 }
 0x262   : > { %v608_v47 = vadd.f32 %v607_v38, %v602_v34 }
 0x264   : > { %v614_v37 = vadd.f32 %v613_v28, %v608_v47 }
 0x266   : > { %1077 = vmatmul.mubr.msk.f32.vlgmr.msra.gmra.mrb[0].mxu1 %vm493_vm3, %v614_v37 }
 0x267   : > { %1094 = vmatprep.mubr.msk.f32.mxu1 %vm1308_vm2, %v1309_v27  ;;  %v784_v27 = vld [vmem:[%s1602_s6] sm:$0xff] }
 0x268   : > { %v1116_v52 = vpack.c.bf16 %v785_v51, %v784_v27 }
 0x26a   : > { %1117 = vmatpush3.bf16.msra.mxu1 %v1116_v52 }
 0x339   : > { %v694_v45 = vpop.f32.mrb[0].mxu1 }
 0x33a   : > { %v695_v48 = vadd.f32 %v1028_v41, %v694_v45  ;;  %v1078_v49 = vpop.f32.mrb[1].mxu1 }
 0x33c   : > { %v698_v50 = vmax.f32 %v695_v48, 0.0 }
 0x33e   : > { %1088 = vmatmul.mubr.msk.f32.vlgmr.msra.gmra.mrb[2].mxu0 %vm493_vm3, %v698_v50  ;;  %v878_v5 = vadd.f32 %v698_v50, %v1475_v32 }
 0x411   : > { %v779_v54 = vpop.f32.mrb[2].mxu0 }
 0x412   : > { %v780_v55 = vadd.f32 %v1030_v53, %v779_v54  ;;  %v1089_v56 = vpop.f32.mrb[3].mxu0 }
 0x414   : > { %1194 = vtanh.f32 %v780_v55 }
 0x41e   : > { %v1195_v57 = vpop.eup %1194 }
 0x41f   : > { %1095 = vmatmul.mubr.msk.f32.vlgmr.msra.gmra.mrb[2].mxu1 %vm793_vm4, %v1195_v57 }
 0x4f2   : > { %v863_v59 = vpop.f32.mrb[2].mxu1 }
 0x4f3   : > { %v864_v60 = vadd.f32 %v1032_v58, %v863_v59  ;;  %v1096_v61 = vpop.f32.mrb[3].mxu1 }
 0x4f5   : > { %887 = vst.msk [vmem:[%s370_s22] sm:$0xff] %vm886_vm5, %v864_v60  ;;  %868 = vrot.lane.b32.xlu1 %v864_v60, %s1310_s25  ;;  %s1232_s22 = sshll.u32 %s1311_s17, 4  ;;  %s1233_s22 = int_to_ptr.vmem [resolvable:$false] %s1232_s22 }
 0x4f6   : > { %s1234_s25 = scalar_lea.vmem %s1233_s22, 256  ;;  %p1235_p2 = scmp.lt.s32.totalorder %s1555_s23, %s1233_s22 }
 0x4f7   : > { %p1236_p3 = scmp.lt.s32.totalorder %s1234_s25, %s1228_s13 }
 0x4f9   : > { %p1237_p4 = por %p1236_p3, %p1235_p2 }
 0x4fb   : > { %p1238_p7 = pnand %p1237_p4, %p1231_p12 }
 0x567   : > { %v869_v62 = vpop.permute.xlu1 %868 }
 0x568   : > { %v871_v63 = vsub.f32 %v864_v60, %v869_v62 }
 0x56a   : > { %v1034_v0 = vmul.f32 -1.442695, %v871_v63 }
 0x56c   : > { %1196 = vpow2.f32 %v1034_v0 }
 0x576   : > { %v1197_v2 = vpop.eup %1196 }
 0x577   : > { %v875_v3 = vadd.f32 1.0, %v1197_v2 }
 0x579   : > { %1198 = vrcp.f32 %v875_v3 }
 0x583   : > { %v1199_v4 = vpop.eup %1198 }
 0x584   : > { %881 = vperm.xlu1 %1190, %v1199_v4  }
 0x603   : > { %v882_v1 = vpop.permute.xlu1 %881 }
 0x604   : > { %v884_v6 = vmul.f32 %v882_v1, %v878_v5 }
 0x606   : > { %885 = vst.msk [vmem:[%s352_s27] sm:$0xff] %vm493_vm3, %v884_v6 }
 0x607   : > { %1241 = shalt.err (!%p1238_p7)
}
 0x608   : > { %s1242_s24 = scalar_lea.hbm %s1553_s14, 128  ;;  %s1246_s27 = scalar_lea.hbm %s1604_s8, 256 }
 0x609   : > { %p1243_p8 = scmp.ne.s32.totalorder %s1553_s14, %s1242_s24  ;;  %p1247_p1 = scmp.lt.u32.totalorder %s1553_s14, %s1604_s8 }
 0x60a   : > { %p1248_p0 = scmp.lt.u32.totalorder %s1246_s27, %s1242_s24  ;;  %p1250_p6 = scmp.lt.u32.totalorder %s1242_s24, %s1553_s14 }
 0x60b   : > { %p1244_p11 = pnand %p1243_p8, %p1616_p9 }
 0x60c   : > { %p1249_p5 = por %p1248_p0, %p1247_p1 }
 0x60d   : > { %p1245_p13 = pneg %p1244_p11 }
 0x60e   : > { %p1251_p10 = por %p1250_p6, %p1249_p5 }
 0x610   : > { %p1252_p12 = pnand %p1251_p10, %p1245_p13 }
 0x612   : > { %1255 = shalt.err (!%p1252_p12)
}
 0x613   : > { %1122 = dma.vmem_to_hbm [thread:$0]  (%p1616_p9), %s1555_s23, 128, %s1553_s14, %s889_s16  }
 0x614 PF: > { %p1134_p2 = scmp.ge.s32.totalorder %s1294_s12, 2  ;;  %s921_s13 = sand.u32 1, %s1282_s30  }
 0x615   : > { %p1617_p3 = scmp.ne.s32.totalorder %s1610_s20, 0  ;;  %s922_s17 = scalar_lea.sflag [#allocation4], %s921_s13 }
 0x617   : > { %p1129_p4 = pnand %p1134_p2, %p1617_p3 }
 0x619   : > { %1277 = dma.done.wait (!%p1129_p4), %s922_s17, 128  }
 0x61a   : > { %1279 = vsyncadd (!%p1129_p4), %s922_s17, 4294967168  ;;  %p21_p7 = scmp.ge.s32.totalorder %s1387_s15, 4   ;;  %s1618_s30 = smov %s1286_s10 }
 0x61b   : > { %s1619_s10 = smov %s1290_s11  ;;  %s1620_s11 = smov %s1398_s18 }
 0x61c   : > { %s1621_s12 = smov %s1387_s15  ;;  %23 = sbr.rel (!%p21_p7) target bundleno = 4 (0x4), region = 108 }
 0x623   :  { %934 = vsyncpa [#allocation3], 1 }
 0x624   :  { %936 = vsyncpa [#allocation3 + $0x1], 1 }
 0x625   :  { %937 = vsyncpa [#allocation4], 1 }
 0x626   :  { %939 = vsyncpa [#allocation4 + $0x1], 1 }

// kernel: tpu_custom_call.1
= control target key start
LH: loop header
LB: loop body
LE: loop exit
PB: predicated region body
PF: predicated region fallthrough
CT: control target
= control target key end

     0   :  { %15 = vsyncpa [#allocation3], 0  ;;  %s1596_s0 = inlined_call_operand.vmem [shape: f32[2,8,32], index: 0, kind: input, shape index: {}]   ;;  %s1597_s1 = inlined_call_operand.vmem [shape: f32[2,8,8], index: 1, kind: input, shape index: {}]   ;;  %s1598_s2 = inlined_call_operand.hbm [shape: f32[2,32,32], index: 2, kind: input, shape index: {}]   ;;  %s1599_s3 = inlined_call_operand.vmem [shape: f32[2,32], index: 3, kind: input, shape index: {}]   ;;  %s1600_s4 = inlined_call_operand.vmem [shape: f32[32,16], index: 4, kind: input, shape index: {}]   ;;  %s1601_s5 = inlined_call_operand.vmem [shape: f32[1,16], index: 5, kind: input, shape index: {}]   ;;  %s1602_s6 = inlined_call_operand.vmem [shape: f32[16,128], index: 6, kind: input, shape index: {}]   ;;  %s1603_s7 = inlined_call_operand.vmem [shape: f32[1,128], index: 7, kind: input, shape index: {}]   ;;  %s1604_s8 = inlined_call_operand.hbm [shape: f32[2,8,32], index: 8, kind: output, shape index: {0}]   ;;  %s1605_s9 = inlined_call_operand.vmem [shape: f32[2,8,2], index: 9, kind: output, shape index: {1}]  }
   0x1   :  { %16 = vsyncpa [#allocation4], 0 }
   0x2   :  { %18 = vsyncpa [#allocation4 + $0x1], 0  ;;  %s1362_s30 = smov 0   ;;  %s1364_s10 = smov 0  }
   0x3   :  { %s1366_s11 = smov 0   ;;  %s1368_s12 = smov 0  }
   0x4 LB: > { %s1383_s13 = sadd.s32 4294967295, %s1294_s12   ;;  %s1016_s14 = sadd.s32 4294967294, %s1294_s12   ;;  %s1294_s12 = sphi %s1368_s12, %s1621_s12   ;;  %s1290_s11 = sphi %s1366_s11, %s1620_s11   ;;  %s1286_s10 = sphi %s1364_s10, %s1619_s10   ;;  %s1282_s30 = sphi %s1362_s30, %s1618_s30  }
   0x5   : > { %s1387_s15 = sadd.s32 1, %s1294_s12   ;;  %s209_s16 = sadd.s32 1, %s1290_s11 }
   0x6   : > { %s206_s17 = ssub.s32 %s1294_s12, %s1387_s15  ;;  %p219_p0 = scmp.ne.s32.totalorder %s1290_s11, %s1286_s10 }
   0x7   : > { %p207_p1 = scmp.eq.s32.totalorder %s206_s17, 0  ;;  %p220_p2 = scmp.eq.s32.totalorder %s1383_s13, 1 }
   0x8   : > { %p225_p3 = scmp.ne.s32.totalorder %s1286_s10, %s1282_s30  ;;  %p226_p4 = scmp.eq.s32.totalorder %s1016_s14, 1 }
   0x9   : > { %s1398_s18 = scalar_select %p207_p1, %s1290_s11, %s209_s16  }
   0xa   : > { %p1400_p5 = por %p220_p2, %p219_p0  ;;  %p1404_p6 = por %p226_p4, %p225_p3 }
   0xb   : > { %p1017_p7 = scmp.ge.s32.totalorder %s1294_s12, 1  ;;  %p259_p8 = scmp.lt.s32.totalorder %s1294_s12, 3 }
   0xc   : > { %s1609_s19 = scalar_select %p1400_p5, 1, 0 }
   0xd   : > { %s1610_s20 = scalar_select %p1404_p6, 1, 0 }
   0xe   : > { %p1606_p9 = scmp.eq.s32.totalorder %s1383_s13, 0  ;;  %p1411_p10 = pnand %p1017_p7, %p259_p8 }
   0xf   : > { %s1296_s22 = smov [#allocation2]   ;;  %s1200_s27 = scalar_lea.hbm %s1598_s2, 1024 }
  0x10   : > { %s1611_s21 = scalar_select %p1411_p10, 1, 0 }
  0x11   : > { %s271_s23 = sshll.u32 %s1296_s22, 4  ;;  %p1124_p11 = pneg %p1411_p10  ;;  %s272_s23 = int_to_ptr.vmem [resolvable:$true] %s271_s23 }
  0x12   : > { %p1201_p13 = scmp.ne.s32.totalorder %s1598_s2, %s1200_s27  ;;  %p1207_p3 = scmp.lt.u32.totalorder %s1200_s27, %s1598_s2 }
  0x13   : > { %p1419_p12 = pnand %p1606_p9, %p1124_p11 }
  0x15   : > { %p1202_p0 = pneg %p1419_p12 }
  0x17   : > { %p1203_p1 = pnand %p1202_p0, %p1201_p13 }
  0x19   : > { %p1204_p2 = pneg %p1203_p1 }
  0x1b   : > { %p1209_p4 = pnand %p1207_p3, %p1204_p2 }
  0x1d   : > { %1212 = shalt.err (!%p1209_p4)
}
  0x1e   : > { %s1213_s17 = scalar_lea.vmem %s272_s23, 1024  ;;  %p1221_p9 = scmp.lt.s32.totalorder %s272_s23, %s272_s23 }
  0x1f   : > { %p1214_p7 = scmp.ne.s32.totalorder %s272_s23, %s1213_s17  ;;  %p1222_p6 = scmp.lt.s32.totalorder %s1213_s17, %s1213_s17 }
  0x21   : > { %p1216_p8 = pnand %p1214_p7, %p1202_p0  ;;  %p1223_p5 = por %p1222_p6, %p1221_p9 }
  0x23   : > { %p1217_p11 = pneg %p1216_p8 }
  0x25   : > { %p1224_p10 = pnand %p1223_p5, %p1217_p11 }
  0x27   : > { %1227 = shalt.err (!%p1224_p10)
}
  0x28   : > { %s1297_s22 = smov 128   ;;  %s1298_s25 = smov 8  }
  0x29   : > { %1127 = dma.hbm_to_vmem [thread:$0]  (!%p1419_p12), %s1598_s2, 1024, %s272_s23, [#allocation3], %s1297_s22, %s1297_s22, %s1298_s25  }
  0x2a   : > { %p1613_p13 = scmp.ne.s32.totalorder %s1611_s21, 0 }
  0x2b   : > { %p1614_p1 = scmp.eq.s32.totalorder (!%p1613_p13), %s1383_s13, 0 }
  0x2c   : > { %316 = sbr.rel (%p1613_p13) target bundleno = 1556 (0x614), region = 52 }
  0x33   : > { %1273 = dma.done.wait (%p1614_p1), [#allocation3], 1024   ;;  %p1615_p0 = pmov %p1614_p1 }
  0x34   : > { %p359_p5 = scmp.lt.s32.totalorder %s1383_s13, 1  ;;  %v373_v0 = vlaneseq  ;;  %vm379_vm1 = vcmask 64512   ;;  %v1299_v6 = vmov 1   ;;  %v1300_v7 = vmov 0   ;;  %v484_v19 = vld [vmem:[#allocation2] sm:$0xff]  ;;  %v485_v20 = vld [vmem:[#allocation2 + $0x8] sm:$0xff] }
  0x35   : > { %1275 = vsyncadd (%p1615_p0), [#allocation3], 4294966272  ;;  %1183 = vset.pattern.permute.xlu1 %v1299_v6  ;;  %1182 = vset.pattern.permute.xlu0 %v1300_v7  ;;  %v1301_v14 = vmov 2   ;;  %v1302_v15 = vmov 3   ;;  %v1303_v16 = vmov 4   ;;  %v1304_v17 = vmov 5  }
  0x36   : > { %s360_s27 = scalar_select %p359_p5, %s1383_s13, 1  ;;  %v1447_v1 = vshrl.u32 %v373_v0, 7  ;;  %v376_v2 = vand.u32 127, %v373_v0  ;;  %v1305_v18 = vmov 6   ;;  %v1098_v21 = vpack.c.bf16 %v485_v20, %v484_v19  ;;  %v486_v23 = vld [vmem:[#allocation2 + $0x10] sm:$0xff]  ;;  %v487_v24 = vld [vmem:[#allocation2 + $0x18] sm:$0xff] }
  0x37   : > { %v1306_v22 = vmov 0.0|0.0   ;;  %v1307_v25 = vmov 7   ;;  %v1101_v26 = vpack.c.bf16 %v487_v24, %v486_v23  ;;  %vm1308_vm2 = vmmov 0   ;;  %s1310_s25 = smov 1   ;;  %s1036_s28 = sshll.u32 %s1383_s13, 7 }
  0x38   : > { %s1449_s24 = sshll.u32 %s360_s27, 3  ;;  %vm377_vm0 = vcmp.eq.s32.totalorder %v1447_v1, %v376_v2  ;;  %v388_v9 = vsub.s32 %v376_v2, %v1447_v1  ;;  %1097 = vmatprep.subr.bf16.mxu0 %v1306_v22  ;;  %1103 = vmatprep.subr.bf16.mxu1 %v1306_v22  ;;  %v1309_v27 = vmov 0.0   ;;  %v420_v30 = vsub.s32 1, %v1447_v1  ;;  %s1553_s14 = scalar_lea.hbm %s1604_s8, %s1036_s28 }
  0x39   : > { %s366_s29 = scalar_lea.vmem %s1597_s1, %s1449_s24  ;;  %1099 = vmatpush3.bf16.msra.mxu0 %v1098_v21  ;;  %1065 = vmatprep.mubr.msk.f32.mxu0 %vm1308_vm2, %v1309_v27  ;;  %s362_s17 = scalar_lea.vmem %s1596_s0, %s1449_s24  ;;  %v411_v31 = vsub.s32 0, %v1447_v1  ;;  %v430_v34 = vsub.s32 2, %v1447_v1  ;;  %v440_v37 = vsub.s32 3, %v1447_v1  ;;  %v450_v40 = vsub.s32 4, %v1447_v1 }
  0x3a   : > { %v372_v3 = vld [vmem:[%s366_s29] sm:$0xff]  ;;  %1100 = vmatprep.subr.bf16.mxu0 %v1306_v22  ;;  %1076 = vmatprep.mubr.msk.f32.mxu1 %vm1308_vm2, %v1309_v27  ;;  %v460_v45 = vsub.s32 5, %v1447_v1  ;;  %v470_v48 = vsub.s32 6, %v1447_v1  ;;  %v480_v56 = vsub.s32 7, %v1447_v1  ;;  %vm493_vm3 = vcmask 261120   ;;  %v617_v1 = vld [vmem:[#allocation2 + $0x28] sm:$0xff]  ;;  %s370_s22 = scalar_lea.vmem %s1605_s9, %s1449_s24 }
  0x3b   : > { %v378_v4 = vsel %vm377_vm0, 1.0, %v372_v3  ;;  %v1475_v32 = vld [vmem:[%s362_s17] sm:$0xff]  ;;  %vm793_vm4 = vcmask 130048   ;;  %vm886_vm5 = vcmask 15360   ;;  %s350_s24 = sand.u32 1, %s1286_s10   ;;  %p1616_p9 = scmp.ne.s32.totalorder %s1609_s19, 0 }
  0x3c   : > { %v380_v5 = vsel %vm379_vm1, %v378_v4, 0.0  ;;  %v421_v35 = vrot.slane %v1475_v32, %v420_v30  ;;  %v412_v36 = vrot.slane %v1475_v32, %v411_v31  ;;  %v431_v39 = vrot.slane %v1475_v32, %v430_v34  ;;  %s1022_s26 = sshll.u32 %s350_s24, 3  ;;  %s889_s16 = scalar_lea.sflag [#allocation4], %s350_s24 }
  0x3d   : > { %381 = vadd.xlane.f32.xlu0 %v380_v5  ;;  %1102 = vmatpush3.bf16.msra.mxu0 %v1101_v26  ;;  %v441_v44 = vrot.slane %v1475_v32, %v440_v37  ;;  %v451_v47 = vrot.slane %v1475_v32, %v450_v40  ;;  %v461_v52 = vrot.slane %v1475_v32, %v460_v45  ;;  %v616_v5 = vld [vmem:[#allocation2 + $0x20] sm:$0xff]  ;;  %s352_s27 = scalar_lea.vmem [#allocation5], %s1022_s26  ;;  %s1311_s17 = smov [#allocation5]  }
  0x3e   : > { %1109 = vmatprep.subr.bf16.mxu0 %v1306_v22  ;;  %v471_v55 = vrot.slane %v1475_v32, %v470_v48  ;;  %v481_v62 = vrot.slane %v1475_v32, %v480_v56  ;;  %v1104_v7 = vpack.c.bf16 %v617_v1, %v616_v5  ;;  %s906_s23 = sshll.u32 %s352_s27, 4  ;;  %s1555_s23 = int_to_ptr.vmem [resolvable:$true] %s906_s23 }
  0x3f   : > { %s1228_s13 = scalar_lea.vmem %s1555_s23, 128 }
  0x40   : > { %1105 = vmatpush3.bf16.msra.mxu1 %v1104_v7  ;;  %p1229_p6 = scmp.ne.s32.totalorder %s1555_s23, %s1228_s13 }
  0x41   : > { %1106 = vmatprep.subr.bf16.mxu1 %v1306_v22 }
  0x42   : > { %p1230_p10 = pnand %p1229_p6, %p1616_p9 }
  0x44   : > { %p1231_p12 = pneg %p1230_p10 }
  0xca   : > { %v382_v8 = vpop.xlane.xlu0 %381 }
  0xcb   : > { %1192 = vrsqrt.f32 %v382_v8  ;;  %v619_v8 = vld [vmem:[#allocation2 + $0x38] sm:$0xff] }
  0xd5   : > { %v1193_v10 = vpop.eup %1192 }
  0xd6   : > { %v384_v11 = vmul.f32 %v1193_v10, %v378_v4  ;;  %v389_v12 = vrot.slane %v1193_v10, %v388_v9  ;;  %v699_v10 = vld [vmem:[%s1600_s4] sm:$0xff] }
  0xd8   : > { %v403_v13 = vmul.f32 %v389_v12, %v384_v11  ;;  %v700_v11 = vld [vmem:[%s1600_s4 + $0x8] sm:$0xff] }
  0xd9   : > { %v1110_v12 = vpack.c.bf16 %v700_v11, %v699_v10 }
  0xda   : > { %415 = vperm.xlu1 %1183, %v403_v13   ;;  %406 = vperm.xlu0 %1182, %v403_v13  }
  0xde   : > { %1184 = vset.pattern.permute.xlu1 %v1301_v14  ;;  %1191 = vset.pattern.permute.xlu0 %v1299_v6 }
  0xdf   : > { %425 = vperm.xlu1 %1184, %v403_v13  }
  0xe3   : > { %1185 = vset.pattern.permute.xlu1 %v1302_v15 }
  0xe4   : > { %435 = vperm.xlu1 %1185, %v403_v13  }
  0xe8   : > { %1186 = vset.pattern.permute.xlu1 %v1303_v16 }
  0xe9   : > { %445 = vperm.xlu1 %1186, %v403_v13  }
  0xed   : > { %1187 = vset.pattern.permute.xlu1 %v1304_v17 }
  0xee   : > { %455 = vperm.xlu1 %1187, %v403_v13  }
  0xf2   : > { %1188 = vset.pattern.permute.xlu1 %v1305_v18 }
  0xf3   : > { %465 = vperm.xlu1 %1188, %v403_v13  }
  0xf7   : > { %1189 = vset.pattern.permute.xlu1 %v1307_v25 }
  0xf8   : > { %475 = vperm.xlu1 %1189, %v403_v13   ;;  %v1026_v13 = vld [vmem:[%s1599_s3] ss:$0 sm:$0xff] }
  0xfc   : > { %1190 = vset.pattern.permute.xlu1 %v1299_v6  ;;  %v618_v6 = vld [vmem:[#allocation2 + $0x30] sm:$0xff] }
  0xfd   : > { %v1107_v9 = vpack.c.bf16 %v619_v8, %v618_v6 }
  0xff   : > { %1108 = vmatpush3.bf16.msra.mxu1 %v1107_v9 }
 0x100   : > { %1115 = vmatprep.subr.bf16.mxu1 %v1306_v22 }
 0x159   : > { %v1465_v28 = vpop.permute.xlu1 %415  ;;  %v407_v38 = vpop.permute.xlu0 %406 }
 0x15a   : > { %v422_v42 = vmul.f32 %v421_v35, %v1465_v28  ;;  %v413_v43 = vmul.f32 %v412_v36, %v407_v38 }
 0x15c   : > { %v423_v50 = vadd.f32 %v422_v42, %v413_v43 }
 0x15e   : > { %v1467_v29 = vpop.permute.xlu1 %425 }
 0x15f   : > { %v432_v46 = vmul.f32 %v431_v39, %v1467_v29 }
 0x161   : > { %v433_v53 = vadd.f32 %v432_v46, %v423_v50 }
 0x163   : > { %v1477_v33 = vpop.permute.xlu1 %435 }
 0x164   : > { %v442_v51 = vmul.f32 %v441_v44, %v1477_v33 }
 0x166   : > { %v443_v57 = vadd.f32 %v442_v51, %v433_v53  ;;  %v785_v51 = vld [vmem:[%s1602_s6 + $0x8] sm:$0xff]  ;;  %v1030_v53 = vld [vmem:[%s1601_s5] ss:$0 sm:$0xff] }
 0x168   : > { %v1485_v41 = vpop.permute.xlu1 %445 }
 0x169   : > { %v452_v54 = vmul.f32 %v451_v47, %v1485_v41 }
 0x16b   : > { %v453_v60 = vadd.f32 %v452_v54, %v443_v57 }
 0x16d   : > { %v456_v49 = vpop.permute.xlu1 %455 }
 0x16e   : > { %v462_v58 = vmul.f32 %v461_v52, %v456_v49 }
 0x170   : > { %v463_v63 = vadd.f32 %v462_v58, %v453_v60  ;;  %v1032_v58 = vld [vmem:[%s1603_s7] ss:$0 sm:$0xff] }
 0x172   : > { %v466_v59 = vpop.permute.xlu1 %465 }
 0x173   : > { %v472_v61 = vmul.f32 %v471_v55, %v466_v59 }
 0x175   : > { %v473_v2 = vadd.f32 %v472_v61, %v463_v63 }
 0x177   : > { %v476_v0 = vpop.permute.xlu1 %475 }
 0x178   : > { %v482_v3 = vmul.f32 %v481_v62, %v476_v0 }
 0x17a   : > { %v483_v4 = vadd.f32 %v482_v3, %v473_v2 }
 0x17c   : > { %1066 = vmatmul.mubr.msk.f32.vlgmr.msra.gmra.mrb[0].mxu0 %vm493_vm3, %v483_v4 }
 0x17d   : > { %1087 = vmatprep.mubr.msk.f32.mxu0 %vm1308_vm2, %v1309_v27  ;;  %1111 = vmatpush3.bf16.msra.mxu0 %v1110_v12 }
 0x17e   : > { %1112 = vmatprep.subr.bf16.mxu0 %v1306_v22 }
 0x24f   : > { %v563_v14 = vpop.f32.mrb[0].mxu0 }
 0x250   : > { %v564_v15 = vadd.f32 %v1026_v13, %v563_v14  ;;  %v1067_v16 = vpop.f32.mrb[1].mxu0 }
 0x252   : > { %v567_v17 = vmax.f32 %v564_v15, 0.0 }
 0x254   : > { %v571_v18 = vrot.slane %v567_v17, %v411_v31  ;;  %v576_v19 = vrot.slane %v567_v17, %v420_v30  ;;  %v582_v20 = vrot.slane %v567_v17, %v430_v34  ;;  %v588_v24 = vrot.slane %v567_v17, %v440_v37 }
 0x255   : > { %v594_v35 = vrot.slane %v567_v17, %v450_v40  ;;  %v600_v39 = vrot.slane %v567_v17, %v460_v45  ;;  %v606_v44 = vrot.slane %v567_v17, %v470_v48  ;;  %v612_v30 = vrot.slane %v567_v17, %v480_v56 }
 0x256   : > { %v572_v21 = vmul.f32 %v571_v18, %v407_v38  ;;  %v577_v23 = vmul.f32 %v576_v19, %v1465_v28  ;;  %v583_v26 = vmul.f32 %v582_v20, %v1467_v29  ;;  %v589_v36 = vmul.f32 %v588_v24, %v1477_v33  ;;  %v701_v29 = vld [vmem:[%s1600_s4 + $0x10] sm:$0xff]  ;;  %v702_v33 = vld [vmem:[%s1600_s4 + $0x18] sm:$0xff] }
 0x257   : > { %v595_v43 = vmul.f32 %v594_v35, %v1485_v41  ;;  %v601_v31 = vmul.f32 %v600_v39, %v456_v49  ;;  %v607_v38 = vmul.f32 %v606_v44, %v466_v59  ;;  %v613_v28 = vmul.f32 %v612_v30, %v476_v0  ;;  %v1028_v41 = vld [vmem:[%s1599_s3 + $0x1] ss:$0 sm:$0xff] }
 0x258   : > { %v578_v25 = vadd.f32 %v577_v23, %v572_v21  ;;  %v1113_v40 = vpack.c.bf16 %v702_v33, %v701_v29 }
 0x25a   : > { %v584_v22 = vadd.f32 %v583_v26, %v578_v25  ;;  %1114 = vmatpush3.bf16.msra.mxu0 %v1113_v40 }
 0x25c   : > { %v590_v42 = vadd.f32 %v589_v36, %v584_v22 }
 0x25e   : > { %v596_v46 = vadd.f32 %v595_v43, %v590_v42 }
 0x260   : > { %v602_v34 = vadd.f32 %v601_v31, %v596_v46 }
 0x262   : > { %v608_v47 = vadd.f32 %v607_v38, %v602_v34 }
 0x264   : > { %v614_v37 = vadd.f32 %v613_v28, %v608_v47 }
 0x266   : > { %1077 = vmatmul.mubr.msk.f32.vlgmr.msra.gmra.mrb[0].mxu1 %vm493_vm3, %v614_v37 }
 0x267   : > { %1094 = vmatprep.mubr.msk.f32.mxu1 %vm1308_vm2, %v1309_v27  ;;  %v784_v27 = vld [vmem:[%s1602_s6] sm:$0xff] }
 0x268   : > { %v1116_v52 = vpack.c.bf16 %v785_v51, %v784_v27 }
 0x26a   : > { %1117 = vmatpush3.bf16.msra.mxu1 %v1116_v52 }
 0x339   : > { %v694_v45 = vpop.f32.mrb[0].mxu1 }
 0x33a   : > { %v695_v48 = vadd.f32 %v1028_v41, %v694_v45  ;;  %v1078_v49 = vpop.f32.mrb[1].mxu1 }
 0x33c   : > { %v698_v50 = vmax.f32 %v695_v48, 0.0 }
 0x33e   : > { %1088 = vmatmul.mubr.msk.f32.vlgmr.msra.gmra.mrb[2].mxu0 %vm493_vm3, %v698_v50  ;;  %v878_v5 = vadd.f32 %v698_v50, %v1475_v32 }
 0x411   : > { %v779_v54 = vpop.f32.mrb[2].mxu0 }
 0x412   : > { %v780_v55 = vadd.f32 %v1030_v53, %v779_v54  ;;  %v1089_v56 = vpop.f32.mrb[3].mxu0 }
 0x414   : > { %1194 = vtanh.f32 %v780_v55 }
 0x41e   : > { %v1195_v57 = vpop.eup %1194 }
 0x41f   : > { %1095 = vmatmul.mubr.msk.f32.vlgmr.msra.gmra.mrb[2].mxu1 %vm793_vm4, %v1195_v57 }
 0x4f2   : > { %v863_v59 = vpop.f32.mrb[2].mxu1 }
 0x4f3   : > { %v864_v60 = vadd.f32 %v1032_v58, %v863_v59  ;;  %v1096_v61 = vpop.f32.mrb[3].mxu1 }
 0x4f5   : > { %887 = vst.msk [vmem:[%s370_s22] sm:$0xff] %vm886_vm5, %v864_v60  ;;  %868 = vrot.lane.b32.xlu1 %v864_v60, %s1310_s25  ;;  %s1232_s22 = sshll.u32 %s1311_s17, 4  ;;  %s1233_s22 = int_to_ptr.vmem [resolvable:$false] %s1232_s22 }
 0x4f6   : > { %s1234_s25 = scalar_lea.vmem %s1233_s22, 256  ;;  %p1235_p2 = scmp.lt.s32.totalorder %s1555_s23, %s1233_s22 }
 0x4f7   : > { %p1236_p3 = scmp.lt.s32.totalorder %s1234_s25, %s1228_s13 }
 0x4f9   : > { %p1237_p4 = por %p1236_p3, %p1235_p2 }
 0x4fb   : > { %p1238_p7 = pnand %p1237_p4, %p1231_p12 }
 0x567   : > { %v869_v62 = vpop.permute.xlu1 %868 }
 0x568   : > { %v871_v63 = vsub.f32 %v864_v60, %v869_v62 }
 0x56a   : > { %v1034_v0 = vmul.f32 -1.442695, %v871_v63 }
 0x56c   : > { %1196 = vpow2.f32 %v1034_v0 }
 0x576   : > { %v1197_v2 = vpop.eup %1196 }
 0x577   : > { %v875_v3 = vadd.f32 1.0, %v1197_v2 }
 0x579   : > { %1198 = vrcp.f32 %v875_v3 }
 0x583   : > { %v1199_v4 = vpop.eup %1198 }
 0x584   : > { %881 = vperm.xlu1 %1190, %v1199_v4  }
 0x603   : > { %v882_v1 = vpop.permute.xlu1 %881 }
 0x604   : > { %v884_v6 = vmul.f32 %v882_v1, %v878_v5 }
 0x606   : > { %885 = vst.msk [vmem:[%s352_s27] sm:$0xff] %vm493_vm3, %v884_v6 }
 0x607   : > { %1241 = shalt.err (!%p1238_p7)
}
 0x608   : > { %s1242_s24 = scalar_lea.hbm %s1553_s14, 128  ;;  %s1246_s27 = scalar_lea.hbm %s1604_s8, 256 }
 0x609   : > { %p1243_p8 = scmp.ne.s32.totalorder %s1553_s14, %s1242_s24  ;;  %p1247_p1 = scmp.lt.u32.totalorder %s1553_s14, %s1604_s8 }
 0x60a   : > { %p1248_p0 = scmp.lt.u32.totalorder %s1246_s27, %s1242_s24  ;;  %p1250_p6 = scmp.lt.u32.totalorder %s1242_s24, %s1553_s14 }
 0x60b   : > { %p1244_p11 = pnand %p1243_p8, %p1616_p9 }
 0x60c   : > { %p1249_p5 = por %p1248_p0, %p1247_p1 }
 0x60d   : > { %p1245_p13 = pneg %p1244_p11 }
 0x60e   : > { %p1251_p10 = por %p1250_p6, %p1249_p5 }
 0x610   : > { %p1252_p12 = pnand %p1251_p10, %p1245_p13 }
 0x612   : > { %1255 = shalt.err (!%p1252_p12)
}
 0x613   : > { %1122 = dma.vmem_to_hbm [thread:$0]  (%p1616_p9), %s1555_s23, 128, %s1553_s14, %s889_s16  }
 0x614 PF: > { %p1134_p2 = scmp.ge.s32.totalorder %s1294_s12, 2  ;;  %s921_s13 = sand.u32 1, %s1282_s30  }
 0x615   : > { %p1617_p3 = scmp.ne.s32.totalorder %s1610_s20, 0  ;;  %s922_s17 = scalar_lea.sflag [#allocation4], %s921_s13 }
 0x617   : > { %p1129_p4 = pnand %p1134_p2, %p1617_p3 }
 0x619   : > { %1277 = dma.done.wait (!%p1129_p4), %s922_s17, 128  }
 0x61a   : > { %1279 = vsyncadd (!%p1129_p4), %s922_s17, 4294967168  ;;  %p21_p7 = scmp.ge.s32.totalorder %s1387_s15, 4   ;;  %s1618_s30 = smov %s1286_s10 }
 0x61b   : > { %s1619_s10 = smov %s1290_s11  ;;  %s1620_s11 = smov %s1398_s18 }
 0x61c   : > { %s1621_s12 = smov %s1387_s15  ;;  %23 = sbr.rel (!%p21_p7) target bundleno = 4 (0x4), region = 108 }
 0x623   :  { %934 = vsyncpa [#allocation3], 1 }
 0x624   :  { %936 = vsyncpa [#allocation3 + $0x1], 1 }
 0x625   :  { %937 = vsyncpa [#allocation4], 1 }
 0x626   :  { %939 = vsyncpa [#allocation4 + $0x1], 1 }

</bundles_post_ra>
